<compile_context>
chip_gen: v6e
topology: v6e:2x2x1
jax: 0.10.0
libtpu: 0.0.40
codegen_flags: <defaults>
</compile_context>

<pallas_src>
import functools
import math

import jax
import jax.numpy as jnp
from jax.experimental import pallas as pl
from jax.experimental.pallas import tpu as pltpu


# ---------------------------------------------------------------------------
# Generation-aware VMEM budgeting.
# ---------------------------------------------------------------------------
def _detect_vmem_capacity():
    try:
        return int(pltpu.get_tpu_info().vmem_capacity_bytes)
    except Exception:
        return 64 * 1024 * 1024            # conservative fallback (v7x per-core VMEM)


_VMEM_CAP = _detect_vmem_capacity()
_VMEM_BUDGET = min(_VMEM_CAP // 2, 48 * 1024 * 1024)        # payload budget for tiling
_VMEM_LIMIT = min((_VMEM_CAP * 3) // 4, 96 * 1024 * 1024)   # scoped-vmem limit


def _pick_tile(dim, candidates, min_blocks=1):
    """Largest candidate dividing `dim`; prefer >= min_blocks grid steps (keeps both
    v7x TensorCores busy); fall back to the largest dividing candidate / full dim."""
    best = None
    for t in candidates:
        if t <= dim and dim % t == 0:
            if best is None:
                best = t
            if dim // t >= min_blocks:
                return t
    return best if best is not None else dim


# ---------------------------------------------------------------------------
# Generic tiled  Y = X @ W + b  kernel (f32 VMEM accumulator, K as the LAST,
# 'arbitrary' grid axis).  Used for QKV / cross-Q / cross-KV projections.
# ---------------------------------------------------------------------------
def _linear_kernel(x_ref, w_ref, b_ref, o_ref, acc_ref):
    k = pl.program_id(2)

    @pl.when(k == 0)
    def _():
        acc_ref[...] = jnp.zeros_like(acc_ref)

    acc_ref[...] += jnp.dot(x_ref[...], w_ref[...],
                            preferred_element_type=jnp.float32)

    @pl.when(k == pl.num_programs(2) - 1)
    def _():
        o_ref[...] = (acc_ref[...]
                      + b_ref[...].astype(jnp.float32)).astype(o_ref.dtype)


def linear(x, w, b):
    M, K = x.shape
    _, N = w.shape
    tm = _pick_tile(M, (256, 128, 64, 32, 16, 8), min_blocks=2)
    tn = _pick_tile(N, (512, 256, 128))   # 256-multiples keep the v6e/v7x MXU full
    tk = _pick_tile(K, (512, 256, 128))
    grid = (M // tm, N // tn, K // tk)
    return pl.pallas_call(
        _linear_kernel,
        grid=grid,
        in_specs=[
            pl.BlockSpec((tm, tk), lambda i, j, k: (i, k)),
            pl.BlockSpec((tk, tn), lambda i, j, k: (k, j)),
            pl.BlockSpec((1, tn), lambda i, j, k: (0, j)),
        ],
        out_specs=pl.BlockSpec((tm, tn), lambda i, j, k: (i, j)),
        out_shape=jax.ShapeDtypeStruct((M, N), x.dtype),
        scratch_shapes=[pltpu.VMEM((tm, tn), jnp.float32)],
        compiler_params=pltpu.CompilerParams(
            dimension_semantics=("parallel", "parallel", "arbitrary"),
            vmem_limit_bytes=_VMEM_LIMIT),
    )(x, w, b.reshape(1, N))


# ---------------------------------------------------------------------------
# Fused MHA + output projection + residual + LayerNorm kernel.
#   grid = (batch, q_blocks); inputs are head-major [B, H, L, dh].
# ---------------------------------------------------------------------------
def _mha_kernel(q_ref, k_ref, v_ref, mask_ref, wo_ref, bo_ref,
                res_ref, g_ref, bln_ref, y_ref, probs_ref, *, scale, eps):
    q = q_ref[...]                                   # [H, tq, dh]
    k = k_ref[...]                                   # [H, Lk, dh]
    v = v_ref[...]                                   # [H, Lk, dh]

    # All-head scores in ONE batched MXU matmul with f32 accumulation.
    s = jnp.einsum("hqd,hkd->hqk", q, k,
                   preferred_element_type=jnp.float32) * scale      # [H, tq, Lk]
    keep = (mask_ref[...] != 0)[None, :, :]                          # [1, tq, Lk]
    s = jnp.where(keep, s, -1e9)                                     # masked_fill semantics

    # One fused softmax pass over all H*tq rows.
    m = jnp.max(s, axis=-1, keepdims=True)
    p = jnp.exp(s - m)
    l = jnp.sum(p, axis=-1, keepdims=True)
    p = p * pl.reciprocal(l, approx=True)            # divide moved to the EUP slot

    # Required module output: single lane-dense store of the probabilities.
    probs_ref[...] = p.astype(probs_ref.dtype)

    # Context per head (batched MXU matmul), then output projection fused in.
    ctx = jnp.einsum("hqk,hkd->hqd", p.astype(v.dtype), v,
                     preferred_element_type=jnp.float32)             # [H, tq, dh]
    wo = wo_ref[...]                                                 # [H, dh, D]
    n_heads = ctx.shape[0]
    # Head accumulation along the OUTER axis (no lane-axis slicing); keeps only a
    # single [tq, D] f32 live value instead of an [H, tq, D] intermediate.
    out = jnp.dot(ctx[0].astype(wo.dtype), wo[0],
                  preferred_element_type=jnp.float32)
    for h in range(1, n_heads):
        out = out + jnp.dot(ctx[h].astype(wo.dtype), wo[h],
                            preferred_element_type=jnp.float32)
    out = out + bo_ref[...].astype(jnp.float32)                      # [tq, D]

    # Fused residual add + LayerNorm; one lane-dense [tq, D] store.
    xr = res_ref[...].astype(jnp.float32) + out
    mean = jnp.mean(xr, axis=-1, keepdims=True)
    xc = xr - mean
    var = jnp.mean(xc * xc, axis=-1, keepdims=True)
    inv = jax.lax.rsqrt(var + eps)
    y = xc * inv * g_ref[...].astype(jnp.float32) + bln_ref[...].astype(jnp.float32)
    y_ref[...] = y.astype(y_ref.dtype)


def _attn_row_tile(Lq, Lk, D, n_heads, dh, x_itemsize, mask_itemsize, probs_itemsize):
    cands = [t for t in (512, 256, 128, 64, 32, 16, 8)
             if t <= Lq and Lq % t == 0] or [Lq]

    def step_bytes(tq):
        per_step = (n_heads * tq * dh * x_itemsize           # q block
                    + 2 * n_heads * Lk * dh * x_itemsize     # resident K + V
                    + tq * Lk * mask_itemsize                # mask block
                    + 2 * tq * D * x_itemsize                # residual in + y out
                    + n_heads * tq * Lk * probs_itemsize)    # probs out
        fixed = (D * D + 3 * D) * x_itemsize                 # Wo + bo/gamma/beta
        return 2 * (per_step + fixed)                        # double buffering

    for t in cands:
        if step_bytes(t) <= _VMEM_BUDGET:
            return t
    return cands[-1]


def mha_ln(q, k, v, mask, w_o, b_o, residual, gamma, beta, n_heads, eps=1e-5):
    """y = LayerNorm(residual + MHA(q,k,v) @ Wo + bo);  also returns attention probs.

    q, k, v are head-major [B, H, L, d_head]; residual is [B, Lq, D]."""
    B, H, Lq, dh = q.shape
    Lk = k.shape[2]
    D = H * dh
    scale = 1.0 / math.sqrt(dh)
    if mask.ndim == 4:                     # [B, 1, Lq, Lk] -> [B, Lq, Lk]
        mask = mask[:, 0]
    probs_dtype = q.dtype                  # bf16 inputs -> bf16 probs (halves O(L^2) HBM write)
    tq = _attn_row_tile(Lq, Lk, D, H, dh, q.dtype.itemsize,
                        mask.dtype.itemsize, jnp.dtype(probs_dtype).itemsize)
    wo3 = w_o.reshape(H, dh, D)            # Wo[h*dh + d, :] == wo3[h, d, :]

    kernel = functools.partial(_mha_kernel, scale=scale, eps=eps)
    out_shape = (
        jax.ShapeDtypeStruct((B, Lq, D), q.dtype),
        jax.ShapeDtypeStruct((B, H, Lq, Lk), probs_dtype),
    )
    return pl.pallas_call(
        kernel,
        grid=(B, Lq // tq),
        in_specs=[
            pl.BlockSpec((None, H, tq, dh), lambda b, i: (b, 0, i, 0)),
            pl.BlockSpec((None, H, Lk, dh), lambda b, i: (b, 0, 0, 0)),
            pl.BlockSpec((None, H, Lk, dh), lambda b, i: (b, 0, 0, 0)),
            pl.BlockSpec((None, tq, Lk), lambda b, i: (b, i, 0)),
            pl.BlockSpec((H, dh, D), lambda b, i: (0, 0, 0)),
            pl.BlockSpec((1, D), lambda b, i: (0, 0)),
            pl.BlockSpec((None, tq, D), lambda b, i: (b, i, 0)),
            pl.BlockSpec((1, D), lambda b, i: (0, 0)),
            pl.BlockSpec((1, D), lambda b, i: (0, 0)),
        ],
        out_specs=(
            pl.BlockSpec((None, tq, D), lambda b, i: (b, i, 0)),
            pl.BlockSpec((None, H, tq, Lk), lambda b, i: (b, 0, i, 0)),
        ),
        out_shape=out_shape,
        compiler_params=pltpu.CompilerParams(
            dimension_semantics=("parallel", "parallel"),
            vmem_limit_bytes=_VMEM_LIMIT),
    )(q, k, v, mask, wo3, b_o.reshape(1, D), residual,
      gamma.reshape(1, D), beta.reshape(1, D))


# ---------------------------------------------------------------------------
# Fused feed-forward + residual + LayerNorm:
#   y = LayerNorm(x + relu(x @ W1 + b1) @ W2 + b2)
#   grid = (row_blocks, d_ff_blocks) with d_ff as the LAST ('arbitrary') axis;
#   the [tm, tf] intermediate activation lives only in VMEM, the residual add
#   and LayerNorm run in the last-step epilogue (x block doubles as residual).
# ---------------------------------------------------------------------------
def _ffn_ln_kernel(x_ref, w1_ref, b1_ref, w2_ref, b2_ref, g_ref, bln_ref,
                   o_ref, acc_ref, *, eps):
    f = pl.program_id(1)

    @pl.when(f == 0)
    def _():
        acc_ref[...] = jnp.zeros_like(acc_ref)

    h = jnp.dot(x_ref[...], w1_ref[...], preferred_element_type=jnp.float32)
    h = jnp.maximum(h + b1_ref[...].astype(jnp.float32), 0.0)
    acc_ref[...] += jnp.dot(h.astype(x_ref.dtype), w2_ref[...],
                            preferred_element_type=jnp.float32)

    @pl.when(f == pl.num_programs(1) - 1)
    def _():
        ff = acc_ref[...] + b2_ref[...].astype(jnp.float32)
        xr = x_ref[...].astype(jnp.float32) + ff          # x block IS the residual
        mean = jnp.mean(xr, axis=-1, keepdims=True)
        xc = xr - mean
        var = jnp.mean(xc * xc, axis=-1, keepdims=True)
        inv = jax.lax.rsqrt(var + eps)
        y = (xc * inv * g_ref[...].astype(jnp.float32)
             + bln_ref[...].astype(jnp.float32))
        o_ref[...] = y.astype(o_ref.dtype)


def feed_forward_ln(x, w1, b1, w2, b2, gamma, beta, eps=1e-5):
    M, D = x.shape
    d_ff = w1.shape[1]
    isz = x.dtype.itemsize
    tm = _pick_tile(M, (256, 128, 64, 32, 16, 8), min_blocks=2)

    def fits(tf):
        per_step = (2 * tm * D + D * tf + tf * D + tf + 3 * D) * isz
        return 2 * per_step + tm * D * 4 <= _VMEM_BUDGET   # + f32 acc scratch

    tf = None
    for t in (2048, 1024, 512, 256, 128):
        if t <= d_ff and d_ff % t == 0 and fits(t):
            tf = t
            break
    if tf is None:
        tf = _pick_tile(d_ff, (512, 256, 128))

    return pl.pallas_call(
        functools.partial(_ffn_ln_kernel, eps=eps),
        grid=(M // tm, d_ff // tf),
        in_specs=[
            pl.BlockSpec((tm, D), lambda i, f: (i, 0)),
            pl.BlockSpec((D, tf), lambda i, f: (0, f)),
            pl.BlockSpec((1, tf), lambda i, f: (0, f)),
            pl.BlockSpec((tf, D), lambda i, f: (f, 0)),
            pl.BlockSpec((1, D), lambda i, f: (0, 0)),
            pl.BlockSpec((1, D), lambda i, f: (0, 0)),
            pl.BlockSpec((1, D), lambda i, f: (0, 0)),
        ],
        out_specs=pl.BlockSpec((tm, D), lambda i, f: (i, 0)),
        out_shape=jax.ShapeDtypeStruct((M, D), x.dtype),
        scratch_shapes=[pltpu.VMEM((tm, D), jnp.float32)],
        compiler_params=pltpu.CompilerParams(
            dimension_semantics=("parallel", "arbitrary"),
            vmem_limit_bytes=_VMEM_LIMIT),
    )(x, w1, b1.reshape(1, d_ff), w2, b2.reshape(1, D),
      gamma.reshape(1, D), beta.reshape(1, D))


# ---------------------------------------------------------------------------
# Full decoder layer (Pallas version of DecoderLayer.forward, eval mode).
# ---------------------------------------------------------------------------
def decoder_layer(x, enc_out, dec_mask, enc_dec_mask, params, n_heads):
    B, Lq, D = x.shape
    Lk = enc_out.shape[1]
    dh = D // n_heads
    x2 = x.reshape(B * Lq, D)
    enc2 = enc_out.reshape(B * Lk, D)

    def to_heads(t, L):
        # [B*L, D] -> [B, H, L, dh]  (cheap XLA layout plumbing outside the kernels)
        return t.reshape(B, L, n_heads, dh).transpose(0, 2, 1, 3)

    # ---- self attention (fused QKV projection; MHA+proj+residual+LN fused) ----
    qkv = linear(x2, params["self_w_qkv"], params["self_b_qkv"])
    q = to_heads(qkv[:, 0 * D:1 * D], Lq)
    k = to_heads(qkv[:, 1 * D:2 * D], Lq)
    v = to_heads(qkv[:, 2 * D:3 * D], Lq)
    x1, atten_dec = mha_ln(q, k, v, dec_mask,
                           params["self_w_o"], params["self_b_o"],
                           x, params["ln1_g"], params["ln1_b"], n_heads)

    # ---- encoder-decoder attention (fused KV projection of enc_out) ----
    x1f = x1.reshape(B * Lq, D)
    q = to_heads(linear(x1f, params["cross_w_q"], params["cross_b_q"]), Lq)
    kv = linear(enc2, params["cross_w_kv"], params["cross_b_kv"])
    k = to_heads(kv[:, :D], Lk)
    v = to_heads(kv[:, D:], Lk)
    x2_, atten_enc_dec = mha_ln(q, k, v, enc_dec_mask,
                                params["cross_w_o"], params["cross_b_o"],
                                x1, params["ln2_g"], params["ln2_b"], n_heads)

    # ---- feed forward with fused residual + LayerNorm epilogue ----
    y = feed_forward_ln(x2_.reshape(B * Lq, D),
                        params["ff_w1"], params["ff_b1"],
                        params["ff_w2"], params["ff_b2"],
                        params["ln3_g"], params["ln3_b"])
    return y.reshape(B, Lq, D), atten_dec, atten_enc_dec


# ---------------------------------------------------------------------------
# Pure-JAX reference (mirrors the PyTorch DecoderLayer in eval mode).
# ---------------------------------------------------------------------------
def _ref_attention(q, k, v, mask, n_heads):
    B, Lq, D = q.shape
    Lk = k.shape[1]
    dh = D // n_heads
    qh = q.reshape(B, Lq, n_heads, dh).transpose(0, 2, 1, 3)
    kh = k.reshape(B, Lk, n_heads, dh).transpose(0, 2, 1, 3)
    vh = v.reshape(B, Lk, n_heads, dh).transpose(0, 2, 1, 3)
    s = jnp.einsum("bhqd,bhkd->bhqk", qh, kh) / math.sqrt(dh)
    s = jnp.where(mask > 0.0, s, -1e9)
    p = jax.nn.softmax(s, axis=-1)
    ctx = jnp.einsum("bhqk,bhkd->bhqd", p, vh)
    return ctx.transpose(0, 2, 1, 3).reshape(B, Lq, D), p


def _ref_layernorm(x, g, b, eps=1e-5):
    mean = jnp.mean(x, axis=-1, keepdims=True)
    var = jnp.mean((x - mean) ** 2, axis=-1, keepdims=True)
    return (x - mean) * jax.lax.rsqrt(var + eps) * g + b


def reference_decoder_layer(x, enc_out, dec_mask, enc_dec_mask, params, n_heads):
    B, Lq, D = x.shape
    Lk = enc_out.shape[1]
    x2 = x.reshape(B * Lq, D)
    enc2 = enc_out.reshape(B * Lk, D)

    qkv = x2 @ params["self_w_qkv"] + params["self_b_qkv"]
    q, k, v = (qkv[:, i * D:(i + 1) * D].reshape(B, Lq, D) for i in range(3))
    ctx, atten_dec = _ref_attention(q, k, v, dec_mask, n_heads)
    proj = ctx.reshape(B * Lq, D) @ params["self_w_o"] + params["self_b_o"]
    x2 = _ref_layernorm(x2 + proj, params["ln1_g"], params["ln1_b"])

    q = (x2 @ params["cross_w_q"] + params["cross_b_q"]).reshape(B, Lq, D)
    kv = enc2 @ params["cross_w_kv"] + params["cross_b_kv"]
    k = kv[:, :D].reshape(B, Lk, D)
    v = kv[:, D:].reshape(B, Lk, D)
    ctx, atten_enc_dec = _ref_attention(q, k, v, enc_dec_mask, n_heads)
    proj = ctx.reshape(B * Lq, D) @ params["cross_w_o"] + params["cross_b_o"]
    x2 = _ref_layernorm(x2 + proj, params["ln2_g"], params["ln2_b"])

    hidden = jnp.maximum(x2 @ params["ff_w1"] + params["ff_b1"], 0.0)
    ff = hidden @ params["ff_w2"] + params["ff_b2"]
    x2 = _ref_layernorm(x2 + ff, params["ln3_g"], params["ln3_b"])

    return x2.reshape(B, Lq, D), atten_dec, atten_enc_dec


if __name__ == "__main__":
    B, Lq, Lk, D, H, D_FF = 2, 8, 16, 32, 4, 64

    key = jax.random.PRNGKey(0)
    keys = jax.random.split(key, 24)
    kit = iter(keys)

    def nrm(shape, scale=0.1):
        return jax.random.normal(next(kit), shape, dtype=jnp.float32) * scale

    params = {
        "self_w_qkv": nrm((D, 3 * D)), "self_b_qkv": nrm((3 * D,)),
        "self_w_o": nrm((D, D)), "self_b_o": nrm((D,)),
        "ln1_g": jnp.ones((D,), jnp.float32) + nrm((D,), 0.05),
        "ln1_b": nrm((D,), 0.05),
        "cross_w_q": nrm((D, D)), "cross_b_q": nrm((D,)),
        "cross_w_kv": nrm((D, 2 * D)), "cross_b_kv": nrm((2 * D,)),
        "cross_w_o": nrm((D, D)), "cross_b_o": nrm((D,)),
        "ln2_g": jnp.ones((D,), jnp.float32) + nrm((D,), 0.05),
        "ln2_b": nrm((D,), 0.05),
        "ff_w1": nrm((D, D_FF)), "ff_b1": nrm((D_FF,)),
        "ff_w2": nrm((D_FF, D)), "ff_b2": nrm((D,)),
        "ln3_g": jnp.ones((D,), jnp.float32) + nrm((D,), 0.05),
        "ln3_b": nrm((D,), 0.05),
    }

    x = jax.random.normal(next(kit), (B, Lq, D), dtype=jnp.float32)
    enc_out = jax.random.normal(next(kit), (B, Lk, D), dtype=jnp.float32)

    # Decoder self-attention mask: causal, float 1.0 = keep / 0.0 = masked.
    causal = jnp.tril(jnp.ones((Lq, Lq), jnp.float32))
    dec_mask = jnp.broadcast_to(causal, (B, 1, Lq, Lq))
    # Encoder-decoder padding mask: batch 1 has its last 4 encoder positions masked.
    enc_valid = jnp.stack([
        jnp.ones((Lk,), jnp.float32),
        jnp.concatenate([jnp.ones((Lk - 4,), jnp.float32),
                         jnp.zeros((4,), jnp.float32)]),
    ])
    enc_dec_mask = enc_valid[:, None, None, :] * jnp.ones((B, 1, Lq, Lk), jnp.float32)

    run = jax.jit(functools.partial(decoder_layer, n_heads=H))
    out, atten_dec, atten_enc_dec = run(x, enc_out, dec_mask, enc_dec_mask, params)
    jax.block_until_ready((out, atten_dec, atten_enc_dec))

    ref_out, ref_ad, ref_aed = reference_decoder_layer(
        x, enc_out, dec_mask, enc_dec_mask, params, H)

    assert out.shape == (B, Lq, D)
    assert atten_dec.shape == (B, H, Lq, Lq)
    assert atten_enc_dec.shape == (B, H, Lq, Lk)
    assert float(jnp.max(jnp.abs(out - ref_out))) < 5e-2
    assert float(jnp.max(jnp.abs(atten_dec - ref_ad))) < 5e-2
    assert float(jnp.max(jnp.abs(atten_enc_dec - ref_aed))) < 5e-2

    print("KERNEL_OK")
</pallas_src>

<mosaic_0001>
module attributes {stable_mosaic.version = 11 : i64} {
  func.func @_linear_kernel(%arg0: i32, %arg1: i32, %arg2: i32, %arg3: memref<8x32xf32, #tpu.memory_space<vmem>>, %arg4: memref<32x96xf32, #tpu.memory_space<vmem>>, %arg5: memref<1x96xf32, #tpu.memory_space<vmem>>, %arg6: memref<8x96xf32, #tpu.memory_space<vmem>>, %arg7: memref<8x96xf32, #tpu.memory_space<vmem>>) attributes {dimension_semantics = [#tpu.dimension_semantics<parallel>, #tpu.dimension_semantics<parallel>, #tpu.dimension_semantics<arbitrary>], iteration_bounds = array<i64: 2, 1, 1>, scalar_prefetch = 0 : i64, scratch_operands = 1 : i64, tpu.core_type = #tpu.core_type<tc>, window_params = [{transform_indices = @transform_0, window_bounds = array<i64: 8, 32>}, {transform_indices = @transform_1, window_bounds = array<i64: 32, 96>}, {transform_indices = @transform_2, window_bounds = array<i64: 1, 96>}, {transform_indices = @transform_3, window_bounds = array<i64: 8, 96>}]} {
    %c0_i32 = arith.constant 0 : i32
    %0 = arith.cmpi eq, %arg2, %c0_i32 : i32
    %1 = arith.extui %0 : i1 to i32
    %c0_i32_0 = arith.constant 0 : i32
    %2 = arith.cmpi ne, %1, %c0_i32_0 : i32
    scf.if %2 {
      %cst_10 = arith.constant 0.000000e+00 : f32
      %12 = vector.broadcast %cst_10 : f32 to vector<8x96xf32>
      %c0_11 = arith.constant 0 : index
      %c0_12 = arith.constant 0 : index
      %13 = vector.load %arg7[%c0_11, %c0_12] : memref<8x96xf32, #tpu.memory_space<vmem>>, vector<8x96xf32>
      tpu.vector_store %arg7[%c0_11, %c0_12], %12 {strides = array<i32>} : memref<8x96xf32, #tpu.memory_space<vmem>>, vector<8x96xf32>,
    } else {
    }
    %c0 = arith.constant 0 : index
    %c0_1 = arith.constant 0 : index
    %3 = vector.load %arg7[%c0, %c0_1] : memref<8x96xf32, #tpu.memory_space<vmem>>, vector<8x96xf32>
    %c0_2 = arith.constant 0 : index
    %c0_3 = arith.constant 0 : index
    %4 = vector.load %arg3[%c0_2, %c0_3] : memref<8x32xf32, #tpu.memory_space<vmem>>, vector<8x32xf32>
    %c0_4 = arith.constant 0 : index
    %c0_5 = arith.constant 0 : index
    %5 = vector.load %arg4[%c0_4, %c0_5] : memref<32x96xf32, #tpu.memory_space<vmem>>, vector<32x96xf32>
    %cst = arith.constant dense<0.000000e+00> : vector<8x96xf32>
    %6 = tpu.matmul %4, %5, %cst {dimension_numbers = #tpu.dot_dimension_numbers<[1], [0], [0], [1], [0, 0, 1, 1], [], []>} : vector<8x32xf32>, vector<32x96xf32>, vector<8x96xf32> -> vector<8x96xf32>
    %7 = arith.addf %3, %6 : vector<8x96xf32>
    %c0_6 = arith.constant 0 : index
    %c0_7 = arith.constant 0 : index
    %8 = vector.load %arg7[%c0_6, %c0_7] : memref<8x96xf32, #tpu.memory_space<vmem>>, vector<8x96xf32>
    tpu.vector_store %arg7[%c0_6, %c0_7], %7 {strides = array<i32>} : memref<8x96xf32, #tpu.memory_space<vmem>>, vector<8x96xf32>,
    %c0_i32_8 = arith.constant 0 : i32
    %9 = arith.cmpi eq, %arg2, %c0_i32_8 : i32
    %10 = arith.extui %9 : i1 to i32
    %c0_i32_9 = arith.constant 0 : i32
    %11 = arith.cmpi ne, %10, %c0_i32_9 : i32
    scf.if %11 {
      %c0_10 = arith.constant 0 : index
      %c0_11 = arith.constant 0 : index
      %12 = vector.load %arg7[%c0_10, %c0_11] : memref<8x96xf32, #tpu.memory_space<vmem>>, vector<8x96xf32>
      %c0_12 = arith.constant 0 : index
      %c0_13 = arith.constant 0 : index
      %13 = vector.load %arg5[%c0_12, %c0_13] : memref<1x96xf32, #tpu.memory_space<vmem>>, vector<1x96xf32>
      %14 = vector.broadcast %13 : vector<1x96xf32> to vector<8x96xf32>
      %15 = arith.addf %12, %14 : vector<8x96xf32>
      %c0_14 = arith.constant 0 : index
      %c0_15 = arith.constant 0 : index
      %16 = vector.load %arg6[%c0_14, %c0_15] : memref<8x96xf32, #tpu.memory_space<vmem>>, vector<8x96xf32>
      tpu.vector_store %arg6[%c0_14, %c0_15], %15 {strides = array<i32>} : memref<8x96xf32, #tpu.memory_space<vmem>>, vector<8x96xf32>,
    } else {
    }
    return
  }
  func.func @transform_0(%arg0: i32, %arg1: i32, %arg2: i32) -> (i32, i32) {
    %c0_i32 = arith.constant 0 : i32
    return %arg0, %arg2 : i32, i32
  }
  func.func @transform_1(%arg0: i32, %arg1: i32, %arg2: i32) -> (i32, i32) {
    %c0_i32 = arith.constant 0 : i32
    return %arg2, %arg1 : i32, i32
  }
  func.func @transform_2(%arg0: i32, %arg1: i32, %arg2: i32) -> (i32, i32) {
    %c0_i32 = arith.constant 0 : i32
    %c0_i32_0 = arith.constant 0 : i32
    return %c0_i32, %arg1 : i32, i32
  }
  func.func @transform_3(%arg0: i32, %arg1: i32, %arg2: i32) -> (i32, i32) {
    %c0_i32 = arith.constant 0 : i32
    return %arg0, %arg1 : i32, i32
  }
}

module attributes {stable_mosaic.version = 11 : i64} {
  func.func @_mha_kernel(%arg0: i32, %arg1: i32, %arg2: memref<1x4x8x8xf32, #tpu.memory_space<vmem>>, %arg3: memref<1x4x8x8xf32, #tpu.memory_space<vmem>>, %arg4: memref<1x4x8x8xf32, #tpu.memory_space<vmem>>, %arg5: memref<1x8x8xf32, #tpu.memory_space<vmem>>, %arg6: memref<4x8x32xf32, #tpu.memory_space<vmem>>, %arg7: memref<1x32xf32, #tpu.memory_space<vmem>>, %arg8: memref<1x8x32xf32, #tpu.memory_space<vmem>>, %arg9: memref<1x32xf32, #tpu.memory_space<vmem>>, %arg10: memref<1x32xf32, #tpu.memory_space<vmem>>, %arg11: memref<1x8x32xf32, #tpu.memory_space<vmem>>, %arg12: memref<1x4x8x8xf32, #tpu.memory_space<vmem>>) attributes {dimension_semantics = [#tpu.dimension_semantics<parallel>, #tpu.dimension_semantics<parallel>], iteration_bounds = array<i64: 2, 1>, scalar_prefetch = 0 : i64, scratch_operands = 0 : i64, tpu.core_type = #tpu.core_type<tc>, window_params = [{transform_indices = @transform_0, window_bounds = array<i64: 1, 4, 8, 8>}, {transform_indices = @transform_1, window_bounds = array<i64: 1, 4, 8, 8>}, {transform_indices = @transform_2, window_bounds = array<i64: 1, 4, 8, 8>}, {transform_indices = @transform_3, window_bounds = array<i64: 1, 8, 8>}, {pipeline_mode = #tpu.pipeline_mode<synchronous>, transform_indices = @transform_4, window_bounds = array<i64: 4, 8, 32>}, {pipeline_mode = #tpu.pipeline_mode<synchronous>, transform_indices = @transform_5, window_bounds = array<i64: 1, 32>}, {transform_indices = @transform_6, window_bounds = array<i64: 1, 8, 32>}, {pipeline_mode = #tpu.pipeline_mode<synchronous>, transform_indices = @transform_7, window_bounds = array<i64: 1, 32>}, {pipeline_mode = #tpu.pipeline_mode<synchronous>, transform_indices = @transform_8, window_bounds = array<i64: 1, 32>}, {transform_indices = @transform_9, window_bounds = array<i64: 1, 8, 32>}, {transform_indices = @transform_10, window_bounds = array<i64: 1, 4, 8, 8>}]} {
    %c0 = arith.constant 0 : index
    %c0_0 = arith.constant 0 : index
    %c0_1 = arith.constant 0 : index
    %c0_2 = arith.constant 0 : index
    %0 = vector.load %arg2[%c0, %c0_0, %c0_1, %c0_2] : memref<1x4x8x8xf32, #tpu.memory_space<vmem>>, vector<1x4x8x8xf32>
    %1 = vector.shape_cast %0 : vector<1x4x8x8xf32> to vector<4x8x8xf32>
    %c0_3 = arith.constant 0 : index
    %c0_4 = arith.constant 0 : index
    %c0_5 = arith.constant 0 : index
    %c0_6 = arith.constant 0 : index
    %2 = vector.load %arg3[%c0_3, %c0_4, %c0_5, %c0_6] : memref<1x4x8x8xf32, #tpu.memory_space<vmem>>, vector<1x4x8x8xf32>
    %3 = vector.shape_cast %2 : vector<1x4x8x8xf32> to vector<4x8x8xf32>
    %c0_7 = arith.constant 0 : index
    %c0_8 = arith.constant 0 : index
    %c0_9 = arith.constant 0 : index
    %c0_10 = arith.constant 0 : index
    %4 = vector.load %arg4[%c0_7, %c0_8, %c0_9, %c0_10] : memref<1x4x8x8xf32, #tpu.memory_space<vmem>>, vector<1x4x8x8xf32>
    %5 = vector.shape_cast %4 : vector<1x4x8x8xf32> to vector<4x8x8xf32>
    "tpu.trace_start"() <{level = 10 : i32, message = "hqd,hkd->hqk"}> : () -> ()
    %cst = arith.constant dense<0.000000e+00> : vector<4x8x8xf32>
    %6 = tpu.matmul %1, %3, %cst {dimension_numbers = #tpu.dot_dimension_numbers<[2], [2], [1], [1], [0, 0, 0, 1, 1, 1], [0], [0]>} : vector<4x8x8xf32>, vector<4x8x8xf32>, vector<4x8x8xf32> -> vector<4x8x8xf32>
    "tpu.trace_stop"() : () -> ()
    %cst_11 = arith.constant 0.353553385 : f32
    %7 = vector.broadcast %cst_11 : f32 to vector<4x8x8xf32>
    %8 = arith.mulf %6, %7 : vector<4x8x8xf32>
    %c0_12 = arith.constant 0 : index
    %c0_13 = arith.constant 0 : index
    %c0_14 = arith.constant 0 : index
    %9 = vector.load %arg5[%c0_12, %c0_13, %c0_14] : memref<1x8x8xf32, #tpu.memory_space<vmem>>, vector<1x8x8xf32>
    %10 = vector.shape_cast %9 : vector<1x8x8xf32> to vector<8x8xf32>
    %cst_15 = arith.constant 0.000000e+00 : f32
    %11 = vector.broadcast %cst_15 : f32 to vector<8x8xf32>
    %12 = arith.cmpf one, %10, %11 : vector<8x8xf32>
    %13 = vector.shape_cast %12 : vector<8x8xi1> to vector<1x8x8xi1>
    %cst_16 = arith.constant -1.000000e+09 : f32
    %14 = vector.shape_cast %13 : vector<1x8x8xi1> to vector<1x8x8xi1>
    %15 = vector.broadcast %14 : vector<1x8x8xi1> to vector<4x8x8xi1>
    %16 = vector.broadcast %cst_16 : f32 to vector<4x8x8xf32>
    %17 = arith.select %15, %8, %16 : vector<4x8x8xi1>, vector<4x8x8xf32>
    %cst_17 = arith.constant dense<0xFF800000> : vector<4x8xf32>
    %18 = vector.multi_reduction <maximumf>, %17, %cst_17 [2] : vector<4x8x8xf32> to vector<4x8xf32>
    %19 = vector.shape_cast %18 : vector<4x8xf32> to vector<4x8x1xf32>
    %20 = vector.broadcast %19 : vector<4x8x1xf32> to vector<4x8x8xf32>
    %21 = arith.subf %17, %20 : vector<4x8x8xf32>
    %22 = math.exp %21 : vector<4x8x8xf32>
    %cst_18 = arith.constant dense<0.000000e+00> : vector<4x8xf32>
    %23 = vector.multi_reduction <add>, %22, %cst_18 [2] : vector<4x8x8xf32> to vector<4x8xf32>
    %24 = vector.shape_cast %23 : vector<4x8xf32> to vector<4x8x1xf32>
    %25 = tpu.reciprocal %24 {approx = true} : vector<4x8x1xf32> -> vector<4x8x1xf32>
    %26 = vector.broadcast %25 : vector<4x8x1xf32> to vector<4x8x8xf32>
    %27 = arith.mulf %22, %26 : vector<4x8x8xf32>
    %c0_19 = arith.constant 0 : index
    %c0_20 = arith.constant 0 : index
    %c0_21 = arith.constant 0 : index
    %c0_22 = arith.constant 0 : index
    %28 = vector.load %arg12[%c0_19, %c0_20, %c0_21, %c0_22] : memref<1x4x8x8xf32, #tpu.memory_space<vmem>>, vector<1x4x8x8xf32>
    %29 = vector.shape_cast %28 : vector<1x4x8x8xf32> to vector<4x8x8xf32>
    %30 = vector.shape_cast %27 : vector<4x8x8xf32> to vector<1x4x8x8xf32>
    tpu.vector_store %arg12[%c0_19, %c0_20, %c0_21, %c0_22], %30 {strides = array<i32>} : memref<1x4x8x8xf32, #tpu.memory_space<vmem>>, vector<1x4x8x8xf32>,
    "tpu.trace_start"() <{level = 10 : i32, message = "hqk,hkd->hqd"}> : () -> ()
    %cst_23 = arith.constant dense<0.000000e+00> : vector<4x8x8xf32>
    %31 = tpu.matmul %27, %5, %cst_23 {dimension_numbers = #tpu.dot_dimension_numbers<[2], [1], [1], [2], [0, 0, 0, 1, 1, 2], [0], [0]>} : vector<4x8x8xf32>, vector<4x8x8xf32>, vector<4x8x8xf32> -> vector<4x8x8xf32>
    "tpu.trace_stop"() : () -> ()
    %c0_24 = arith.constant 0 : index
    %c0_25 = arith.constant 0 : index
    %c0_26 = arith.constant 0 : index
    %32 = vector.load %arg6[%c0_24, %c0_25, %c0_26] : memref<4x8x32xf32, #tpu.memory_space<vmem>>, vector<4x8x32xf32>
    %33 = vector.extract_strided_slice %31 {offsets = [0, 0, 0], sizes = [1, 8, 8], strides = [1, 1, 1]} : vector<4x8x8xf32> to vector<1x8x8xf32>
    %34 = vector.shape_cast %33 : vector<1x8x8xf32> to vector<8x8xf32>
    %35 = vector.extract_strided_slice %32 {offsets = [0, 0, 0], sizes = [1, 8, 32], strides = [1, 1, 1]} : vector<4x8x32xf32> to vector<1x8x32xf32>
    %36 = vector.shape_cast %35 : vector<1x8x32xf32> to vector<8x32xf32>
    %cst_27 = arith.constant dense<0.000000e+00> : vector<8x32xf32>
    %37 = tpu.matmul %34, %36, %cst_27 {dimension_numbers = #tpu.dot_dimension_numbers<[1], [0], [0], [1], [0, 0, 1, 1], [], []>} : vector<8x8xf32>, vector<8x32xf32>, vector<8x32xf32> -> vector<8x32xf32>
    %38 = vector.extract_strided_slice %31 {offsets = [1, 0, 0], sizes = [1, 8, 8], strides = [1, 1, 1]} : vector<4x8x8xf32> to vector<1x8x8xf32>
    %39 = vector.shape_cast %38 : vector<1x8x8xf32> to vector<8x8xf32>
    %40 = vector.extract_strided_slice %32 {offsets = [1, 0, 0], sizes = [1, 8, 32], strides = [1, 1, 1]} : vector<4x8x32xf32> to vector<1x8x32xf32>
    %41 = vector.shape_cast %40 : vector<1x8x32xf32> to vector<8x32xf32>
    %cst_28 = arith.constant dense<0.000000e+00> : vector<8x32xf32>
    %42 = tpu.matmul %39, %41, %cst_28 {dimension_numbers = #tpu.dot_dimension_numbers<[1], [0], [0], [1], [0, 0, 1, 1], [], []>} : vector<8x8xf32>, vector<8x32xf32>, vector<8x32xf32> -> vector<8x32xf32>
    %43 = arith.addf %37, %42 : vector<8x32xf32>
    %44 = vector.extract_strided_slice %31 {offsets = [2, 0, 0], sizes = [1, 8, 8], strides = [1, 1, 1]} : vector<4x8x8xf32> to vector<1x8x8xf32>
    %45 = vector.shape_cast %44 : vector<1x8x8xf32> to vector<8x8xf32>
    %46 = vector.extract_strided_slice %32 {offsets = [2, 0, 0], sizes = [1, 8, 32], strides = [1, 1, 1]} : vector<4x8x32xf32> to vector<1x8x32xf32>
    %47 = vector.shape_cast %46 : vector<1x8x32xf32> to vector<8x32xf32>
    %cst_29 = arith.constant dense<0.000000e+00> : vector<8x32xf32>
    %48 = tpu.matmul %45, %47, %cst_29 {dimension_numbers = #tpu.dot_dimension_numbers<[1], [0], [0], [1], [0, 0, 1, 1], [], []>} : vector<8x8xf32>, vector<8x32xf32>, vector<8x32xf32> -> vector<8x32xf32>
    %49 = arith.addf %43, %48 : vector<8x32xf32>
    %50 = vector.extract_strided_slice %31 {offsets = [3, 0, 0], sizes = [1, 8, 8], strides = [1, 1, 1]} : vector<4x8x8xf32> to vector<1x8x8xf32>
    %51 = vector.shape_cast %50 : vector<1x8x8xf32> to vector<8x8xf32>
    %52 = vector.extract_strided_slice %32 {offsets = [3, 0, 0], sizes = [1, 8, 32], strides = [1, 1, 1]} : vector<4x8x32xf32> to vector<1x8x32xf32>
    %53 = vector.shape_cast %52 : vector<1x8x32xf32> to vector<8x32xf32>
    %cst_30 = arith.constant dense<0.000000e+00> : vector<8x32xf32>
    %54 = tpu.matmul %51, %53, %cst_30 {dimension_numbers = #tpu.dot_dimension_numbers<[1], [0], [0], [1], [0, 0, 1, 1], [], []>} : vector<8x8xf32>, vector<8x32xf32>, vector<8x32xf32> -> vector<8x32xf32>
    %55 = arith.addf %49, %54 : vector<8x32xf32>
    %c0_31 = arith.constant 0 : index
    %c0_32 = arith.constant 0 : index
    %56 = vector.load %arg7[%c0_31, %c0_32] : memref<1x32xf32, #tpu.memory_space<vmem>>, vector<1x32xf32>
    %57 = vector.broadcast %56 : vector<1x32xf32> to vector<8x32xf32>
    %58 = arith.addf %55, %57 : vector<8x32xf32>
    %c0_33 = arith.constant 0 : index
    %c0_34 = arith.constant 0 : index
    %c0_35 = arith.constant 0 : index
    %59 = vector.load %arg8[%c0_33, %c0_34, %c0_35] : memref<1x8x32xf32, #tpu.memory_space<vmem>>, vector<1x8x32xf32>
    %60 = vector.shape_cast %59 : vector<1x8x32xf32> to vector<8x32xf32>
    %61 = arith.addf %60, %58 : vector<8x32xf32>
    %cst_36 = arith.constant dense<0.000000e+00> : vector<8xf32>
    %62 = vector.multi_reduction <add>, %61, %cst_36 [1] : vector<8x32xf32> to vector<8xf32>
    %63 = vector.shape_cast %62 : vector<8xf32> to vector<8x1xf32>
    %cst_37 = arith.constant 3.200000e+01 : f32
    %64 = vector.broadcast %cst_37 : f32 to vector<8x1xf32>
    %65 = arith.divf %63, %64 : vector<8x1xf32>
    %66 = vector.broadcast %65 : vector<8x1xf32> to vector<8x32xf32>
    %67 = arith.subf %61, %66 : vector<8x32xf32>
    %68 = arith.mulf %67, %67 : vector<8x32xf32>
    %cst_38 = arith.constant dense<0.000000e+00> : vector<8xf32>
    %69 = vector.multi_reduction <add>, %68, %cst_38 [1] : vector<8x32xf32> to vector<8xf32>
    %70 = vector.shape_cast %69 : vector<8xf32> to vector<8x1xf32>
    %cst_39 = arith.constant 3.200000e+01 : f32
    %71 = vector.broadcast %cst_39 : f32 to vector<8x1xf32>
    %72 = arith.divf %70, %71 : vector<8x1xf32>
    %cst_40 = arith.constant 9.99999974E-6 : f32
    %73 = vector.broadcast %cst_40 : f32 to vector<8x1xf32>
    %74 = arith.addf %72, %73 : vector<8x1xf32>
    %75 = math.rsqrt %74 : vector<8x1xf32>
    %76 = vector.broadcast %75 : vector<8x1xf32> to vector<8x32xf32>
    %77 = arith.mulf %67, %76 : vector<8x32xf32>
    %c0_41 = arith.constant 0 : index
    %c0_42 = arith.constant 0 : index
    %78 = vector.load %arg9[%c0_41, %c0_42] : memref<1x32xf32, #tpu.memory_space<vmem>>, vector<1x32xf32>
    %79 = vector.broadcast %78 : vector<1x32xf32> to vector<8x32xf32>
    %80 = arith.mulf %77, %79 : vector<8x32xf32>
    %c0_43 = arith.constant 0 : index
    %c0_44 = arith.constant 0 : index
    %81 = vector.load %arg10[%c0_43, %c0_44] : memref<1x32xf32, #tpu.memory_space<vmem>>, vector<1x32xf32>
    %82 = vector.broadcast %81 : vector<1x32xf32> to vector<8x32xf32>
    %83 = arith.addf %80, %82 : vector<8x32xf32>
    %c0_45 = arith.constant 0 : index
    %c0_46 = arith.constant 0 : index
    %c0_47 = arith.constant 0 : index
    %84 = vector.load %arg11[%c0_45, %c0_46, %c0_47] : memref<1x8x32xf32, #tpu.memory_space<vmem>>, vector<1x8x32xf32>
    %85 = vector.shape_cast %84 : vector<1x8x32xf32> to vector<8x32xf32>
    %86 = vector.shape_cast %83 : vector<8x32xf32> to vector<1x8x32xf32>
    tpu.vector_store %arg11[%c0_45, %c0_46, %c0_47], %86 {strides = array<i32>} : memref<1x8x32xf32, #tpu.memory_space<vmem>>, vector<1x8x32xf32>,
    return
  }
  func.func @transform_0(%arg0: i32, %arg1: i32) -> (i32, i32, i32, i32) {
    %c0_i32 = arith.constant 0 : i32
    %c0_i32_0 = arith.constant 0 : i32
    %c0_i32_1 = arith.constant 0 : i32
    return %arg0, %c0_i32, %arg1, %c0_i32_0 : i32, i32, i32, i32
  }
  func.func @transform_1(%arg0: i32, %arg1: i32) -> (i32, i32, i32, i32) {
    %c0_i32 = arith.constant 0 : i32
    %c0_i32_0 = arith.constant 0 : i32
    %c0_i32_1 = arith.constant 0 : i32
    %c0_i32_2 = arith.constant 0 : i32
    return %arg0, %c0_i32, %c0_i32_0, %c0_i32_1 : i32, i32, i32, i32
  }
  func.func @transform_2(%arg0: i32, %arg1: i32) -> (i32, i32, i32, i32) {
    %c0_i32 = arith.constant 0 : i32
    %c0_i32_0 = arith.constant 0 : i32
    %c0_i32_1 = arith.constant 0 : i32
    %c0_i32_2 = arith.constant 0 : i32
    return %arg0, %c0_i32, %c0_i32_0, %c0_i32_1 : i32, i32, i32, i32
  }
  func.func @transform_3(%arg0: i32, %arg1: i32) -> (i32, i32, i32) {
    %c0_i32 = arith.constant 0 : i32
    %c0_i32_0 = arith.constant 0 : i32
    return %arg0, %arg1, %c0_i32 : i32, i32, i32
  }
  func.func @transform_4(%arg0: i32, %arg1: i32) -> (i32, i32, i32) {
    %c0_i32 = arith.constant 0 : i32
    %c0_i32_0 = arith.constant 0 : i32
    %c0_i32_1 = arith.constant 0 : i32
    %c0_i32_2 = arith.constant 0 : i32
    return %c0_i32, %c0_i32_0, %c0_i32_1 : i32, i32, i32
  }
  func.func @transform_5(%arg0: i32, %arg1: i32) -> (i32, i32) {
    %c0_i32 = arith.constant 0 : i32
    %c0_i32_0 = arith.constant 0 : i32
    %c0_i32_1 = arith.constant 0 : i32
    return %c0_i32, %c0_i32_0 : i32, i32
  }
  func.func @transform_6(%arg0: i32, %arg1: i32) -> (i32, i32, i32) {
    %c0_i32 = arith.constant 0 : i32
    %c0_i32_0 = arith.constant 0 : i32
    return %arg0, %arg1, %c0_i32 : i32, i32, i32
  }
  func.func @transform_7(%arg0: i32, %arg1: i32) -> (i32, i32) {
    %c0_i32 = arith.constant 0 : i32
    %c0_i32_0 = arith.constant 0 : i32
    %c0_i32_1 = arith.constant 0 : i32
    return %c0_i32, %c0_i32_0 : i32, i32
  }
  func.func @transform_8(%arg0: i32, %arg1: i32) -> (i32, i32) {
    %c0_i32 = arith.constant 0 : i32
    %c0_i32_0 = arith.constant 0 : i32
    %c0_i32_1 = arith.constant 0 : i32
    return %c0_i32, %c0_i32_0 : i32, i32
  }
  func.func @transform_9(%arg0: i32, %arg1: i32) -> (i32, i32, i32) {
    %c0_i32 = arith.constant 0 : i32
    %c0_i32_0 = arith.constant 0 : i32
    return %arg0, %arg1, %c0_i32 : i32, i32, i32
  }
  func.func @transform_10(%arg0: i32, %arg1: i32) -> (i32, i32, i32, i32) {
    %c0_i32 = arith.constant 0 : i32
    %c0_i32_0 = arith.constant 0 : i32
    %c0_i32_1 = arith.constant 0 : i32
    return %arg0, %c0_i32, %arg1, %c0_i32_0 : i32, i32, i32, i32
  }
}

module attributes {stable_mosaic.version = 11 : i64} {
  func.func @_linear_kernel(%arg0: i32, %arg1: i32, %arg2: i32, %arg3: memref<8x32xf32, #tpu.memory_space<vmem>>, %arg4: memref<32x32xf32, #tpu.memory_space<vmem>>, %arg5: memref<1x32xf32, #tpu.memory_space<vmem>>, %arg6: memref<8x32xf32, #tpu.memory_space<vmem>>, %arg7: memref<8x32xf32, #tpu.memory_space<vmem>>) attributes {dimension_semantics = [#tpu.dimension_semantics<parallel>, #tpu.dimension_semantics<parallel>, #tpu.dimension_semantics<arbitrary>], iteration_bounds = array<i64: 2, 1, 1>, scalar_prefetch = 0 : i64, scratch_operands = 1 : i64, tpu.core_type = #tpu.core_type<tc>, window_params = [{transform_indices = @transform_0, window_bounds = array<i64: 8, 32>}, {transform_indices = @transform_1, window_bounds = array<i64: 32, 32>}, {transform_indices = @transform_2, window_bounds = array<i64: 1, 32>}, {transform_indices = @transform_3, window_bounds = array<i64: 8, 32>}]} {
    %c0_i32 = arith.constant 0 : i32
    %0 = arith.cmpi eq, %arg2, %c0_i32 : i32
    %1 = arith.extui %0 : i1 to i32
    %c0_i32_0 = arith.constant 0 : i32
    %2 = arith.cmpi ne, %1, %c0_i32_0 : i32
    scf.if %2 {
      %cst_10 = arith.constant 0.000000e+00 : f32
      %12 = vector.broadcast %cst_10 : f32 to vector<8x32xf32>
      %c0_11 = arith.constant 0 : index
      %c0_12 = arith.constant 0 : index
      %13 = vector.load %arg7[%c0_11, %c0_12] : memref<8x32xf32, #tpu.memory_space<vmem>>, vector<8x32xf32>
      tpu.vector_store %arg7[%c0_11, %c0_12], %12 {strides = array<i32>} : memref<8x32xf32, #tpu.memory_space<vmem>>, vector<8x32xf32>,
    } else {
    }
    %c0 = arith.constant 0 : index
    %c0_1 = arith.constant 0 : index
    %3 = vector.load %arg7[%c0, %c0_1] : memref<8x32xf32, #tpu.memory_space<vmem>>, vector<8x32xf32>
    %c0_2 = arith.constant 0 : index
    %c0_3 = arith.constant 0 : index
    %4 = vector.load %arg3[%c0_2, %c0_3] : memref<8x32xf32, #tpu.memory_space<vmem>>, vector<8x32xf32>
    %c0_4 = arith.constant 0 : index
    %c0_5 = arith.constant 0 : index
    %5 = vector.load %arg4[%c0_4, %c0_5] : memref<32x32xf32, #tpu.memory_space<vmem>>, vector<32x32xf32>
    %cst = arith.constant dense<0.000000e+00> : vector<8x32xf32>
    %6 = tpu.matmul %4, %5, %cst {dimension_numbers = #tpu.dot_dimension_numbers<[1], [0], [0], [1], [0, 0, 1, 1], [], []>} : vector<8x32xf32>, vector<32x32xf32>, vector<8x32xf32> -> vector<8x32xf32>
    %7 = arith.addf %3, %6 : vector<8x32xf32>
    %c0_6 = arith.constant 0 : index
    %c0_7 = arith.constant 0 : index
    %8 = vector.load %arg7[%c0_6, %c0_7] : memref<8x32xf32, #tpu.memory_space<vmem>>, vector<8x32xf32>
    tpu.vector_store %arg7[%c0_6, %c0_7], %7 {strides = array<i32>} : memref<8x32xf32, #tpu.memory_space<vmem>>, vector<8x32xf32>,
    %c0_i32_8 = arith.constant 0 : i32
    %9 = arith.cmpi eq, %arg2, %c0_i32_8 : i32
    %10 = arith.extui %9 : i1 to i32
    %c0_i32_9 = arith.constant 0 : i32
    %11 = arith.cmpi ne, %10, %c0_i32_9 : i32
    scf.if %11 {
      %c0_10 = arith.constant 0 : index
      %c0_11 = arith.constant 0 : index
      %12 = vector.load %arg7[%c0_10, %c0_11] : memref<8x32xf32, #tpu.memory_space<vmem>>, vector<8x32xf32>
      %c0_12 = arith.constant 0 : index
      %c0_13 = arith.constant 0 : index
      %13 = vector.load %arg5[%c0_12, %c0_13] : memref<1x32xf32, #tpu.memory_space<vmem>>, vector<1x32xf32>
      %14 = vector.broadcast %13 : vector<1x32xf32> to vector<8x32xf32>
      %15 = arith.addf %12, %14 : vector<8x32xf32>
      %c0_14 = arith.constant 0 : index
      %c0_15 = arith.constant 0 : index
      %16 = vector.load %arg6[%c0_14, %c0_15] : memref<8x32xf32, #tpu.memory_space<vmem>>, vector<8x32xf32>
      tpu.vector_store %arg6[%c0_14, %c0_15], %15 {strides = array<i32>} : memref<8x32xf32, #tpu.memory_space<vmem>>, vector<8x32xf32>,
    } else {
    }
    return
  }
  func.func @transform_0(%arg0: i32, %arg1: i32, %arg2: i32) -> (i32, i32) {
    %c0_i32 = arith.constant 0 : i32
    return %arg0, %arg2 : i32, i32
  }
  func.func @transform_1(%arg0: i32, %arg1: i32, %arg2: i32) -> (i32, i32) {
    %c0_i32 = arith.constant 0 : i32
    return %arg2, %arg1 : i32, i32
  }
  func.func @transform_2(%arg0: i32, %arg1: i32, %arg2: i32) -> (i32, i32) {
    %c0_i32 = arith.constant 0 : i32
    %c0_i32_0 = arith.constant 0 : i32
    return %c0_i32, %arg1 : i32, i32
  }
  func.func @transform_3(%arg0: i32, %arg1: i32, %arg2: i32) -> (i32, i32) {
    %c0_i32 = arith.constant 0 : i32
    return %arg0, %arg1 : i32, i32
  }
}

module attributes {stable_mosaic.version = 11 : i64} {
  func.func @_linear_kernel(%arg0: i32, %arg1: i32, %arg2: i32, %arg3: memref<16x32xf32, #tpu.memory_space<vmem>>, %arg4: memref<32x64xf32, #tpu.memory_space<vmem>>, %arg5: memref<1x64xf32, #tpu.memory_space<vmem>>, %arg6: memref<16x64xf32, #tpu.memory_space<vmem>>, %arg7: memref<16x64xf32, #tpu.memory_space<vmem>>) attributes {dimension_semantics = [#tpu.dimension_semantics<parallel>, #tpu.dimension_semantics<parallel>, #tpu.dimension_semantics<arbitrary>], iteration_bounds = array<i64: 2, 1, 1>, scalar_prefetch = 0 : i64, scratch_operands = 1 : i64, tpu.core_type = #tpu.core_type<tc>, window_params = [{transform_indices = @transform_0, window_bounds = array<i64: 16, 32>}, {transform_indices = @transform_1, window_bounds = array<i64: 32, 64>}, {transform_indices = @transform_2, window_bounds = array<i64: 1, 64>}, {transform_indices = @transform_3, window_bounds = array<i64: 16, 64>}]} {
    %c0_i32 = arith.constant 0 : i32
    %0 = arith.cmpi eq, %arg2, %c0_i32 : i32
    %1 = arith.extui %0 : i1 to i32
    %c0_i32_0 = arith.constant 0 : i32
    %2 = arith.cmpi ne, %1, %c0_i32_0 : i32
    scf.if %2 {
      %cst_10 = arith.constant 0.000000e+00 : f32
      %12 = vector.broadcast %cst_10 : f32 to vector<16x64xf32>
      %c0_11 = arith.constant 0 : index
      %c0_12 = arith.constant 0 : index
      %13 = vector.load %arg7[%c0_11, %c0_12] : memref<16x64xf32, #tpu.memory_space<vmem>>, vector<16x64xf32>
      tpu.vector_store %arg7[%c0_11, %c0_12], %12 {strides = array<i32>} : memref<16x64xf32, #tpu.memory_space<vmem>>, vector<16x64xf32>,
    } else {
    }
    %c0 = arith.constant 0 : index
    %c0_1 = arith.constant 0 : index
    %3 = vector.load %arg7[%c0, %c0_1] : memref<16x64xf32, #tpu.memory_space<vmem>>, vector<16x64xf32>
    %c0_2 = arith.constant 0 : index
    %c0_3 = arith.constant 0 : index
    %4 = vector.load %arg3[%c0_2, %c0_3] : memref<16x32xf32, #tpu.memory_space<vmem>>, vector<16x32xf32>
    %c0_4 = arith.constant 0 : index
    %c0_5 = arith.constant 0 : index
    %5 = vector.load %arg4[%c0_4, %c0_5] : memref<32x64xf32, #tpu.memory_space<vmem>>, vector<32x64xf32>
    %cst = arith.constant dense<0.000000e+00> : vector<16x64xf32>
    %6 = tpu.matmul %4, %5, %cst {dimension_numbers = #tpu.dot_dimension_numbers<[1], [0], [0], [1], [0, 0, 1, 1], [], []>} : vector<16x32xf32>, vector<32x64xf32>, vector<16x64xf32> -> vector<16x64xf32>
    %7 = arith.addf %3, %6 : vector<16x64xf32>
    %c0_6 = arith.constant 0 : index
    %c0_7 = arith.constant 0 : index
    %8 = vector.load %arg7[%c0_6, %c0_7] : memref<16x64xf32, #tpu.memory_space<vmem>>, vector<16x64xf32>
    tpu.vector_store %arg7[%c0_6, %c0_7], %7 {strides = array<i32>} : memref<16x64xf32, #tpu.memory_space<vmem>>, vector<16x64xf32>,
    %c0_i32_8 = arith.constant 0 : i32
    %9 = arith.cmpi eq, %arg2, %c0_i32_8 : i32
    %10 = arith.extui %9 : i1 to i32
    %c0_i32_9 = arith.constant 0 : i32
    %11 = arith.cmpi ne, %10, %c0_i32_9 : i32
    scf.if %11 {
      %c0_10 = arith.constant 0 : index
      %c0_11 = arith.constant 0 : index
      %12 = vector.load %arg7[%c0_10, %c0_11] : memref<16x64xf32, #tpu.memory_space<vmem>>, vector<16x64xf32>
      %c0_12 = arith.constant 0 : index
      %c0_13 = arith.constant 0 : index
      %13 = vector.load %arg5[%c0_12, %c0_13] : memref<1x64xf32, #tpu.memory_space<vmem>>, vector<1x64xf32>
      %14 = vector.broadcast %13 : vector<1x64xf32> to vector<16x64xf32>
      %15 = arith.addf %12, %14 : vector<16x64xf32>
      %c0_14 = arith.constant 0 : index
      %c0_15 = arith.constant 0 : index
      %16 = vector.load %arg6[%c0_14, %c0_15] : memref<16x64xf32, #tpu.memory_space<vmem>>, vector<16x64xf32>
      tpu.vector_store %arg6[%c0_14, %c0_15], %15 {strides = array<i32>} : memref<16x64xf32, #tpu.memory_space<vmem>>, vector<16x64xf32>,
    } else {
    }
    return
  }
  func.func @transform_0(%arg0: i32, %arg1: i32, %arg2: i32) -> (i32, i32) {
    %c0_i32 = arith.constant 0 : i32
    return %arg0, %arg2 : i32, i32
  }
  func.func @transform_1(%arg0: i32, %arg1: i32, %arg2: i32) -> (i32, i32) {
    %c0_i32 = arith.constant 0 : i32
    return %arg2, %arg1 : i32, i32
  }
  func.func @transform_2(%arg0: i32, %arg1: i32, %arg2: i32) -> (i32, i32) {
    %c0_i32 = arith.constant 0 : i32
    %c0_i32_0 = arith.constant 0 : i32
    return %c0_i32, %arg1 : i32, i32
  }
  func.func @transform_3(%arg0: i32, %arg1: i32, %arg2: i32) -> (i32, i32) {
    %c0_i32 = arith.constant 0 : i32
    return %arg0, %arg1 : i32, i32
  }
}

module attributes {stable_mosaic.version = 11 : i64} {
  func.func @_mha_kernel(%arg0: i32, %arg1: i32, %arg2: memref<1x4x8x8xf32, #tpu.memory_space<vmem>>, %arg3: memref<1x4x16x8xf32, #tpu.memory_space<vmem>>, %arg4: memref<1x4x16x8xf32, #tpu.memory_space<vmem>>, %arg5: memref<1x8x16xf32, #tpu.memory_space<vmem>>, %arg6: memref<4x8x32xf32, #tpu.memory_space<vmem>>, %arg7: memref<1x32xf32, #tpu.memory_space<vmem>>, %arg8: memref<1x8x32xf32, #tpu.memory_space<vmem>>, %arg9: memref<1x32xf32, #tpu.memory_space<vmem>>, %arg10: memref<1x32xf32, #tpu.memory_space<vmem>>, %arg11: memref<1x8x32xf32, #tpu.memory_space<vmem>>, %arg12: memref<1x4x8x16xf32, #tpu.memory_space<vmem>>) attributes {dimension_semantics = [#tpu.dimension_semantics<parallel>, #tpu.dimension_semantics<parallel>], iteration_bounds = array<i64: 2, 1>, scalar_prefetch = 0 : i64, scratch_operands = 0 : i64, tpu.core_type = #tpu.core_type<tc>, window_params = [{transform_indices = @transform_0, window_bounds = array<i64: 1, 4, 8, 8>}, {transform_indices = @transform_1, window_bounds = array<i64: 1, 4, 16, 8>}, {transform_indices = @transform_2, window_bounds = array<i64: 1, 4, 16, 8>}, {transform_indices = @transform_3, window_bounds = array<i64: 1, 8, 16>}, {pipeline_mode = #tpu.pipeline_mode<synchronous>, transform_indices = @transform_4, window_bounds = array<i64: 4, 8, 32>}, {pipeline_mode = #tpu.pipeline_mode<synchronous>, transform_indices = @transform_5, window_bounds = array<i64: 1, 32>}, {transform_indices = @transform_6, window_bounds = array<i64: 1, 8, 32>}, {pipeline_mode = #tpu.pipeline_mode<synchronous>, transform_indices = @transform_7, window_bounds = array<i64: 1, 32>}, {pipeline_mode = #tpu.pipeline_mode<synchronous>, transform_indices = @transform_8, window_bounds = array<i64: 1, 32>}, {transform_indices = @transform_9, window_bounds = array<i64: 1, 8, 32>}, {transform_indices = @transform_10, window_bounds = array<i64: 1, 4, 8, 16>}]} {
    %c0 = arith.constant 0 : index
    %c0_0 = arith.constant 0 : index
    %c0_1 = arith.constant 0 : index
    %c0_2 = arith.constant 0 : index
    %0 = vector.load %arg2[%c0, %c0_0, %c0_1, %c0_2] : memref<1x4x8x8xf32, #tpu.memory_space<vmem>>, vector<1x4x8x8xf32>
    %1 = vector.shape_cast %0 : vector<1x4x8x8xf32> to vector<4x8x8xf32>
    %c0_3 = arith.constant 0 : index
    %c0_4 = arith.constant 0 : index
    %c0_5 = arith.constant 0 : index
    %c0_6 = arith.constant 0 : index
    %2 = vector.load %arg3[%c0_3, %c0_4, %c0_5, %c0_6] : memref<1x4x16x8xf32, #tpu.memory_space<vmem>>, vector<1x4x16x8xf32>
    %3 = vector.shape_cast %2 : vector<1x4x16x8xf32> to vector<4x16x8xf32>
    %c0_7 = arith.constant 0 : index
    %c0_8 = arith.constant 0 : index
    %c0_9 = arith.constant 0 : index
    %c0_10 = arith.constant 0 : index
    %4 = vector.load %arg4[%c0_7, %c0_8, %c0_9, %c0_10] : memref<1x4x16x8xf32, #tpu.memory_space<vmem>>, vector<1x4x16x8xf32>
    %5 = vector.shape_cast %4 : vector<1x4x16x8xf32> to vector<4x16x8xf32>
    "tpu.trace_start"() <{level = 10 : i32, message = "hqd,hkd->hqk"}> : () -> ()
    %cst = arith.constant dense<0.000000e+00> : vector<4x8x16xf32>
    %6 = tpu.matmul %1, %3, %cst {dimension_numbers = #tpu.dot_dimension_numbers<[2], [2], [1], [1], [0, 0, 0, 1, 1, 1], [0], [0]>} : vector<4x8x8xf32>, vector<4x16x8xf32>, vector<4x8x16xf32> -> vector<4x8x16xf32>
    "tpu.trace_stop"() : () -> ()
    %cst_11 = arith.constant 0.353553385 : f32
    %7 = vector.broadcast %cst_11 : f32 to vector<4x8x16xf32>
    %8 = arith.mulf %6, %7 : vector<4x8x16xf32>
    %c0_12 = arith.constant 0 : index
    %c0_13 = arith.constant 0 : index
    %c0_14 = arith.constant 0 : index
    %9 = vector.load %arg5[%c0_12, %c0_13, %c0_14] : memref<1x8x16xf32, #tpu.memory_space<vmem>>, vector<1x8x16xf32>
    %10 = vector.shape_cast %9 : vector<1x8x16xf32> to vector<8x16xf32>
    %cst_15 = arith.constant 0.000000e+00 : f32
    %11 = vector.broadcast %cst_15 : f32 to vector<8x16xf32>
    %12 = arith.cmpf one, %10, %11 : vector<8x16xf32>
    %13 = vector.shape_cast %12 : vector<8x16xi1> to vector<1x8x16xi1>
    %cst_16 = arith.constant -1.000000e+09 : f32
    %14 = vector.shape_cast %13 : vector<1x8x16xi1> to vector<1x8x16xi1>
    %15 = vector.broadcast %14 : vector<1x8x16xi1> to vector<4x8x16xi1>
    %16 = vector.broadcast %cst_16 : f32 to vector<4x8x16xf32>
    %17 = arith.select %15, %8, %16 : vector<4x8x16xi1>, vector<4x8x16xf32>
    %cst_17 = arith.constant dense<0xFF800000> : vector<4x8xf32>
    %18 = vector.multi_reduction <maximumf>, %17, %cst_17 [2] : vector<4x8x16xf32> to vector<4x8xf32>
    %19 = vector.shape_cast %18 : vector<4x8xf32> to vector<4x8x1xf32>
    %20 = vector.broadcast %19 : vector<4x8x1xf32> to vector<4x8x16xf32>
    %21 = arith.subf %17, %20 : vector<4x8x16xf32>
    %22 = math.exp %21 : vector<4x8x16xf32>
    %cst_18 = arith.constant dense<0.000000e+00> : vector<4x8xf32>
    %23 = vector.multi_reduction <add>, %22, %cst_18 [2] : vector<4x8x16xf32> to vector<4x8xf32>
    %24 = vector.shape_cast %23 : vector<4x8xf32> to vector<4x8x1xf32>
    %25 = tpu.reciprocal %24 {approx = true} : vector<4x8x1xf32> -> vector<4x8x1xf32>
    %26 = vector.broadcast %25 : vector<4x8x1xf32> to vector<4x8x16xf32>
    %27 = arith.mulf %22, %26 : vector<4x8x16xf32>
    %c0_19 = arith.constant 0 : index
    %c0_20 = arith.constant 0 : index
    %c0_21 = arith.constant 0 : index
    %c0_22 = arith.constant 0 : index
    %28 = vector.load %arg12[%c0_19, %c0_20, %c0_21, %c0_22] : memref<1x4x8x16xf32, #tpu.memory_space<vmem>>, vector<1x4x8x16xf32>
    %29 = vector.shape_cast %28 : vector<1x4x8x16xf32> to vector<4x8x16xf32>
    %30 = vector.shape_cast %27 : vector<4x8x16xf32> to vector<1x4x8x16xf32>
    tpu.vector_store %arg12[%c0_19, %c0_20, %c0_21, %c0_22], %30 {strides = array<i32>} : memref<1x4x8x16xf32, #tpu.memory_space<vmem>>, vector<1x4x8x16xf32>,
    "tpu.trace_start"() <{level = 10 : i32, message = "hqk,hkd->hqd"}> : () -> ()
    %cst_23 = arith.constant dense<0.000000e+00> : vector<4x8x8xf32>
    %31 = tpu.matmul %27, %5, %cst_23 {dimension_numbers = #tpu.dot_dimension_numbers<[2], [1], [1], [2], [0, 0, 0, 1, 1, 2], [0], [0]>} : vector<4x8x16xf32>, vector<4x16x8xf32>, vector<4x8x8xf32> -> vector<4x8x8xf32>
    "tpu.trace_stop"() : () -> ()
    %c0_24 = arith.constant 0 : index
    %c0_25 = arith.constant 0 : index
    %c0_26 = arith.constant 0 : index
    %32 = vector.load %arg6[%c0_24, %c0_25, %c0_26] : memref<4x8x32xf32, #tpu.memory_space<vmem>>, vector<4x8x32xf32>
    %33 = vector.extract_strided_slice %31 {offsets = [0, 0, 0], sizes = [1, 8, 8], strides = [1, 1, 1]} : vector<4x8x8xf32> to vector<1x8x8xf32>
    %34 = vector.shape_cast %33 : vector<1x8x8xf32> to vector<8x8xf32>
    %35 = vector.extract_strided_slice %32 {offsets = [0, 0, 0], sizes = [1, 8, 32], strides = [1, 1, 1]} : vector<4x8x32xf32> to vector<1x8x32xf32>
    %36 = vector.shape_cast %35 : vector<1x8x32xf32> to vector<8x32xf32>
    %cst_27 = arith.constant dense<0.000000e+00> : vector<8x32xf32>
    %37 = tpu.matmul %34, %36, %cst_27 {dimension_numbers = #tpu.dot_dimension_numbers<[1], [0], [0], [1], [0, 0, 1, 1], [], []>} : vector<8x8xf32>, vector<8x32xf32>, vector<8x32xf32> -> vector<8x32xf32>
    %38 = vector.extract_strided_slice %31 {offsets = [1, 0, 0], sizes = [1, 8, 8], strides = [1, 1, 1]} : vector<4x8x8xf32> to vector<1x8x8xf32>
    %39 = vector.shape_cast %38 : vector<1x8x8xf32> to vector<8x8xf32>
    %40 = vector.extract_strided_slice %32 {offsets = [1, 0, 0], sizes = [1, 8, 32], strides = [1, 1, 1]} : vector<4x8x32xf32> to vector<1x8x32xf32>
    %41 = vector.shape_cast %40 : vector<1x8x32xf32> to vector<8x32xf32>
    %cst_28 = arith.constant dense<0.000000e+00> : vector<8x32xf32>
    %42 = tpu.matmul %39, %41, %cst_28 {dimension_numbers = #tpu.dot_dimension_numbers<[1], [0], [0], [1], [0, 0, 1, 1], [], []>} : vector<8x8xf32>, vector<8x32xf32>, vector<8x32xf32> -> vector<8x32xf32>
    %43 = arith.addf %37, %42 : vector<8x32xf32>
    %44 = vector.extract_strided_slice %31 {offsets = [2, 0, 0], sizes = [1, 8, 8], strides = [1, 1, 1]} : vector<4x8x8xf32> to vector<1x8x8xf32>
    %45 = vector.shape_cast %44 : vector<1x8x8xf32> to vector<8x8xf32>
    %46 = vector.extract_strided_slice %32 {offsets = [2, 0, 0], sizes = [1, 8, 32], strides = [1, 1, 1]} : vector<4x8x32xf32> to vector<1x8x32xf32>
    %47 = vector.shape_cast %46 : vector<1x8x32xf32> to vector<8x32xf32>
    %cst_29 = arith.constant dense<0.000000e+00> : vector<8x32xf32>
    %48 = tpu.matmul %45, %47, %cst_29 {dimension_numbers = #tpu.dot_dimension_numbers<[1], [0], [0], [1], [0, 0, 1, 1], [], []>} : vector<8x8xf32>, vector<8x32xf32>, vector<8x32xf32> -> vector<8x32xf32>
    %49 = arith.addf %43, %48 : vector<8x32xf32>
    %50 = vector.extract_strided_slice %31 {offsets = [3, 0, 0], sizes = [1, 8, 8], strides = [1, 1, 1]} : vector<4x8x8xf32> to vector<1x8x8xf32>
    %51 = vector.shape_cast %50 : vector<1x8x8xf32> to vector<8x8xf32>
    %52 = vector.extract_strided_slice %32 {offsets = [3, 0, 0], sizes = [1, 8, 32], strides = [1, 1, 1]} : vector<4x8x32xf32> to vector<1x8x32xf32>
    %53 = vector.shape_cast %52 : vector<1x8x32xf32> to vector<8x32xf32>
    %cst_30 = arith.constant dense<0.000000e+00> : vector<8x32xf32>
    %54 = tpu.matmul %51, %53, %cst_30 {dimension_numbers = #tpu.dot_dimension_numbers<[1], [0], [0], [1], [0, 0, 1, 1], [], []>} : vector<8x8xf32>, vector<8x32xf32>, vector<8x32xf32> -> vector<8x32xf32>
    %55 = arith.addf %49, %54 : vector<8x32xf32>
    %c0_31 = arith.constant 0 : index
    %c0_32 = arith.constant 0 : index
    %56 = vector.load %arg7[%c0_31, %c0_32] : memref<1x32xf32, #tpu.memory_space<vmem>>, vector<1x32xf32>
    %57 = vector.broadcast %56 : vector<1x32xf32> to vector<8x32xf32>
    %58 = arith.addf %55, %57 : vector<8x32xf32>
    %c0_33 = arith.constant 0 : index
    %c0_34 = arith.constant 0 : index
    %c0_35 = arith.constant 0 : index
    %59 = vector.load %arg8[%c0_33, %c0_34, %c0_35] : memref<1x8x32xf32, #tpu.memory_space<vmem>>, vector<1x8x32xf32>
    %60 = vector.shape_cast %59 : vector<1x8x32xf32> to vector<8x32xf32>
    %61 = arith.addf %60, %58 : vector<8x32xf32>
    %cst_36 = arith.constant dense<0.000000e+00> : vector<8xf32>
    %62 = vector.multi_reduction <add>, %61, %cst_36 [1] : vector<8x32xf32> to vector<8xf32>
    %63 = vector.shape_cast %62 : vector<8xf32> to vector<8x1xf32>
    %cst_37 = arith.constant 3.200000e+01 : f32
    %64 = vector.broadcast %cst_37 : f32 to vector<8x1xf32>
    %65 = arith.divf %63, %64 : vector<8x1xf32>
    %66 = vector.broadcast %65 : vector<8x1xf32> to vector<8x32xf32>
    %67 = arith.subf %61, %66 : vector<8x32xf32>
    %68 = arith.mulf %67, %67 : vector<8x32xf32>
    %cst_38 = arith.constant dense<0.000000e+00> : vector<8xf32>
    %69 = vector.multi_reduction <add>, %68, %cst_38 [1] : vector<8x32xf32> to vector<8xf32>
    %70 = vector.shape_cast %69 : vector<8xf32> to vector<8x1xf32>
    %cst_39 = arith.constant 3.200000e+01 : f32
    %71 = vector.broadcast %cst_39 : f32 to vector<8x1xf32>
    %72 = arith.divf %70, %71 : vector<8x1xf32>
    %cst_40 = arith.constant 9.99999974E-6 : f32
    %73 = vector.broadcast %cst_40 : f32 to vector<8x1xf32>
    %74 = arith.addf %72, %73 : vector<8x1xf32>
    %75 = math.rsqrt %74 : vector<8x1xf32>
    %76 = vector.broadcast %75 : vector<8x1xf32> to vector<8x32xf32>
    %77 = arith.mulf %67, %76 : vector<8x32xf32>
    %c0_41 = arith.constant 0 : index
    %c0_42 = arith.constant 0 : index
    %78 = vector.load %arg9[%c0_41, %c0_42] : memref<1x32xf32, #tpu.memory_space<vmem>>, vector<1x32xf32>
    %79 = vector.broadcast %78 : vector<1x32xf32> to vector<8x32xf32>
    %80 = arith.mulf %77, %79 : vector<8x32xf32>
    %c0_43 = arith.constant 0 : index
    %c0_44 = arith.constant 0 : index
    %81 = vector.load %arg10[%c0_43, %c0_44] : memref<1x32xf32, #tpu.memory_space<vmem>>, vector<1x32xf32>
    %82 = vector.broadcast %81 : vector<1x32xf32> to vector<8x32xf32>
    %83 = arith.addf %80, %82 : vector<8x32xf32>
    %c0_45 = arith.constant 0 : index
    %c0_46 = arith.constant 0 : index
    %c0_47 = arith.constant 0 : index
    %84 = vector.load %arg11[%c0_45, %c0_46, %c0_47] : memref<1x8x32xf32, #tpu.memory_space<vmem>>, vector<1x8x32xf32>
    %85 = vector.shape_cast %84 : vector<1x8x32xf32> to vector<8x32xf32>
    %86 = vector.shape_cast %83 : vector<8x32xf32> to vector<1x8x32xf32>
    tpu.vector_store %arg11[%c0_45, %c0_46, %c0_47], %86 {strides = array<i32>} : memref<1x8x32xf32, #tpu.memory_space<vmem>>, vector<1x8x32xf32>,
    return
  }
  func.func @transform_0(%arg0: i32, %arg1: i32) -> (i32, i32, i32, i32) {
    %c0_i32 = arith.constant 0 : i32
    %c0_i32_0 = arith.constant 0 : i32
    %c0_i32_1 = arith.constant 0 : i32
    return %arg0, %c0_i32, %arg1, %c0_i32_0 : i32, i32, i32, i32
  }
  func.func @transform_1(%arg0: i32, %arg1: i32) -> (i32, i32, i32, i32) {
    %c0_i32 = arith.constant 0 : i32
    %c0_i32_0 = arith.constant 0 : i32
    %c0_i32_1 = arith.constant 0 : i32
    %c0_i32_2 = arith.constant 0 : i32
    return %arg0, %c0_i32, %c0_i32_0, %c0_i32_1 : i32, i32, i32, i32
  }
  func.func @transform_2(%arg0: i32, %arg1: i32) -> (i32, i32, i32, i32) {
    %c0_i32 = arith.constant 0 : i32
    %c0_i32_0 = arith.constant 0 : i32
    %c0_i32_1 = arith.constant 0 : i32
    %c0_i32_2 = arith.constant 0 : i32
    return %arg0, %c0_i32, %c0_i32_0, %c0_i32_1 : i32, i32, i32, i32
  }
  func.func @transform_3(%arg0: i32, %arg1: i32) -> (i32, i32, i32) {
    %c0_i32 = arith.constant 0 : i32
    %c0_i32_0 = arith.constant 0 : i32
    return %arg0, %arg1, %c0_i32 : i32, i32, i32
  }
  func.func @transform_4(%arg0: i32, %arg1: i32) -> (i32, i32, i32) {
    %c0_i32 = arith.constant 0 : i32
    %c0_i32_0 = arith.constant 0 : i32
    %c0_i32_1 = arith.constant 0 : i32
    %c0_i32_2 = arith.constant 0 : i32
    return %c0_i32, %c0_i32_0, %c0_i32_1 : i32, i32, i32
  }
  func.func @transform_5(%arg0: i32, %arg1: i32) -> (i32, i32) {
    %c0_i32 = arith.constant 0 : i32
    %c0_i32_0 = arith.constant 0 : i32
    %c0_i32_1 = arith.constant 0 : i32
    return %c0_i32, %c0_i32_0 : i32, i32
  }
  func.func @transform_6(%arg0: i32, %arg1: i32) -> (i32, i32, i32) {
    %c0_i32 = arith.constant 0 : i32
    %c0_i32_0 = arith.constant 0 : i32
    return %arg0, %arg1, %c0_i32 : i32, i32, i32
  }
  func.func @transform_7(%arg0: i32, %arg1: i32) -> (i32, i32) {
    %c0_i32 = arith.constant 0 : i32
    %c0_i32_0 = arith.constant 0 : i32
    %c0_i32_1 = arith.constant 0 : i32
    return %c0_i32, %c0_i32_0 : i32, i32
  }
  func.func @transform_8(%arg0: i32, %arg1: i32) -> (i32, i32) {
    %c0_i32 = arith.constant 0 : i32
    %c0_i32_0 = arith.constant 0 : i32
    %c0_i32_1 = arith.constant 0 : i32
    return %c0_i32, %c0_i32_0 : i32, i32
  }
  func.func @transform_9(%arg0: i32, %arg1: i32) -> (i32, i32, i32) {
    %c0_i32 = arith.constant 0 : i32
    %c0_i32_0 = arith.constant 0 : i32
    return %arg0, %arg1, %c0_i32 : i32, i32, i32
  }
  func.func @transform_10(%arg0: i32, %arg1: i32) -> (i32, i32, i32, i32) {
    %c0_i32 = arith.constant 0 : i32
    %c0_i32_0 = arith.constant 0 : i32
    %c0_i32_1 = arith.constant 0 : i32
    return %arg0, %c0_i32, %arg1, %c0_i32_0 : i32, i32, i32, i32
  }
}

module attributes {stable_mosaic.version = 11 : i64} {
  func.func @_ffn_ln_kernel(%arg0: i32, %arg1: i32, %arg2: memref<8x32xf32, #tpu.memory_space<vmem>>, %arg3: memref<32x64xf32, #tpu.memory_space<vmem>>, %arg4: memref<1x64xf32, #tpu.memory_space<vmem>>, %arg5: memref<64x32xf32, #tpu.memory_space<vmem>>, %arg6: memref<1x32xf32, #tpu.memory_space<vmem>>, %arg7: memref<1x32xf32, #tpu.memory_space<vmem>>, %arg8: memref<1x32xf32, #tpu.memory_space<vmem>>, %arg9: memref<8x32xf32, #tpu.memory_space<vmem>>, %arg10: memref<8x32xf32, #tpu.memory_space<vmem>>) attributes {dimension_semantics = [#tpu.dimension_semantics<parallel>, #tpu.dimension_semantics<arbitrary>], iteration_bounds = array<i64: 2, 1>, scalar_prefetch = 0 : i64, scratch_operands = 1 : i64, tpu.core_type = #tpu.core_type<tc>, window_params = [{transform_indices = @transform_0, window_bounds = array<i64: 8, 32>}, {transform_indices = @transform_1, window_bounds = array<i64: 32, 64>}, {transform_indices = @transform_2, window_bounds = array<i64: 1, 64>}, {transform_indices = @transform_3, window_bounds = array<i64: 64, 32>}, {pipeline_mode = #tpu.pipeline_mode<synchronous>, transform_indices = @transform_4, window_bounds = array<i64: 1, 32>}, {pipeline_mode = #tpu.pipeline_mode<synchronous>, transform_indices = @transform_5, window_bounds = array<i64: 1, 32>}, {pipeline_mode = #tpu.pipeline_mode<synchronous>, transform_indices = @transform_6, window_bounds = array<i64: 1, 32>}, {transform_indices = @transform_7, window_bounds = array<i64: 8, 32>}]} {
    %c0_i32 = arith.constant 0 : i32
    %0 = arith.cmpi eq, %arg1, %c0_i32 : i32
    %1 = arith.extui %0 : i1 to i32
    %c0_i32_0 = arith.constant 0 : i32
    %2 = arith.cmpi ne, %1, %c0_i32_0 : i32
    scf.if %2 {
      %cst_16 = arith.constant 0.000000e+00 : f32
      %19 = vector.broadcast %cst_16 : f32 to vector<8x32xf32>
      %c0_17 = arith.constant 0 : index
      %c0_18 = arith.constant 0 : index
      %20 = vector.load %arg10[%c0_17, %c0_18] : memref<8x32xf32, #tpu.memory_space<vmem>>, vector<8x32xf32>
      tpu.vector_store %arg10[%c0_17, %c0_18], %19 {strides = array<i32>} : memref<8x32xf32, #tpu.memory_space<vmem>>, vector<8x32xf32>,
    } else {
    }
    %c0 = arith.constant 0 : index
    %c0_1 = arith.constant 0 : index
    %3 = vector.load %arg2[%c0, %c0_1] : memref<8x32xf32, #tpu.memory_space<vmem>>, vector<8x32xf32>
    %c0_2 = arith.constant 0 : index
    %c0_3 = arith.constant 0 : index
    %4 = vector.load %arg3[%c0_2, %c0_3] : memref<32x64xf32, #tpu.memory_space<vmem>>, vector<32x64xf32>
    %cst = arith.constant dense<0.000000e+00> : vector<8x64xf32>
    %5 = tpu.matmul %3, %4, %cst {dimension_numbers = #tpu.dot_dimension_numbers<[1], [0], [0], [1], [0, 0, 1, 1], [], []>} : vector<8x32xf32>, vector<32x64xf32>, vector<8x64xf32> -> vector<8x64xf32>
    %c0_4 = arith.constant 0 : index
    %c0_5 = arith.constant 0 : index
    %6 = vector.load %arg4[%c0_4, %c0_5] : memref<1x64xf32, #tpu.memory_space<vmem>>, vector<1x64xf32>
    %7 = vector.broadcast %6 : vector<1x64xf32> to vector<8x64xf32>
    %8 = arith.addf %5, %7 : vector<8x64xf32>
    %cst_6 = arith.constant 0.000000e+00 : f32
    %9 = vector.broadcast %cst_6 : f32 to vector<8x64xf32>
    %10 = arith.maximumf %8, %9 : vector<8x64xf32>
    %c0_7 = arith.constant 0 : index
    %c0_8 = arith.constant 0 : index
    %11 = vector.load %arg10[%c0_7, %c0_8] : memref<8x32xf32, #tpu.memory_space<vmem>>, vector<8x32xf32>
    %c0_9 = arith.constant 0 : index
    %c0_10 = arith.constant 0 : index
    %12 = vector.load %arg5[%c0_9, %c0_10] : memref<64x32xf32, #tpu.memory_space<vmem>>, vector<64x32xf32>
    %cst_11 = arith.constant dense<0.000000e+00> : vector<8x32xf32>
    %13 = tpu.matmul %10, %12, %cst_11 {dimension_numbers = #tpu.dot_dimension_numbers<[1], [0], [0], [1], [0, 0, 1, 1], [], []>} : vector<8x64xf32>, vector<64x32xf32>, vector<8x32xf32> -> vector<8x32xf32>
    %14 = arith.addf %11, %13 : vector<8x32xf32>
    %c0_12 = arith.constant 0 : index
    %c0_13 = arith.constant 0 : index
    %15 = vector.load %arg10[%c0_12, %c0_13] : memref<8x32xf32, #tpu.memory_space<vmem>>, vector<8x32xf32>
    tpu.vector_store %arg10[%c0_12, %c0_13], %14 {strides = array<i32>} : memref<8x32xf32, #tpu.memory_space<vmem>>, vector<8x32xf32>,
    %c0_i32_14 = arith.constant 0 : i32
    %16 = arith.cmpi eq, %arg1, %c0_i32_14 : i32
    %17 = arith.extui %16 : i1 to i32
    %c0_i32_15 = arith.constant 0 : i32
    %18 = arith.cmpi ne, %17, %c0_i32_15 : i32
    scf.if %18 {
      %c0_16 = arith.constant 0 : index
      %c0_17 = arith.constant 0 : index
      %19 = vector.load %arg10[%c0_16, %c0_17] : memref<8x32xf32, #tpu.memory_space<vmem>>, vector<8x32xf32>
      %c0_18 = arith.constant 0 : index
      %c0_19 = arith.constant 0 : index
      %20 = vector.load %arg6[%c0_18, %c0_19] : memref<1x32xf32, #tpu.memory_space<vmem>>, vector<1x32xf32>
      %21 = vector.broadcast %20 : vector<1x32xf32> to vector<8x32xf32>
      %22 = arith.addf %19, %21 : vector<8x32xf32>
      %c0_20 = arith.constant 0 : index
      %c0_21 = arith.constant 0 : index
      %23 = vector.load %arg2[%c0_20, %c0_21] : memref<8x32xf32, #tpu.memory_space<vmem>>, vector<8x32xf32>
      %24 = arith.addf %23, %22 : vector<8x32xf32>
      %cst_22 = arith.constant dense<0.000000e+00> : vector<8xf32>
      %25 = vector.multi_reduction <add>, %24, %cst_22 [1] : vector<8x32xf32> to vector<8xf32>
      %26 = vector.shape_cast %25 : vector<8xf32> to vector<8x1xf32>
      %cst_23 = arith.constant 3.200000e+01 : f32
      %27 = vector.broadcast %cst_23 : f32 to vector<8x1xf32>
      %28 = arith.divf %26, %27 : vector<8x1xf32>
      %29 = vector.broadcast %28 : vector<8x1xf32> to vector<8x32xf32>
      %30 = arith.subf %24, %29 : vector<8x32xf32>
      %31 = arith.mulf %30, %30 : vector<8x32xf32>
      %cst_24 = arith.constant dense<0.000000e+00> : vector<8xf32>
      %32 = vector.multi_reduction <add>, %31, %cst_24 [1] : vector<8x32xf32> to vector<8xf32>
      %33 = vector.shape_cast %32 : vector<8xf32> to vector<8x1xf32>
      %cst_25 = arith.constant 3.200000e+01 : f32
      %34 = vector.broadcast %cst_25 : f32 to vector<8x1xf32>
      %35 = arith.divf %33, %34 : vector<8x1xf32>
      %cst_26 = arith.constant 9.99999974E-6 : f32
      %36 = vector.broadcast %cst_26 : f32 to vector<8x1xf32>
      %37 = arith.addf %35, %36 : vector<8x1xf32>
      %38 = math.rsqrt %37 : vector<8x1xf32>
      %39 = vector.broadcast %38 : vector<8x1xf32> to vector<8x32xf32>
      %40 = arith.mulf %30, %39 : vector<8x32xf32>
      %c0_27 = arith.constant 0 : index
      %c0_28 = arith.constant 0 : index
      %41 = vector.load %arg7[%c0_27, %c0_28] : memref<1x32xf32, #tpu.memory_space<vmem>>, vector<1x32xf32>
      %42 = vector.broadcast %41 : vector<1x32xf32> to vector<8x32xf32>
      %43 = arith.mulf %40, %42 : vector<8x32xf32>
      %c0_29 = arith.constant 0 : index
      %c0_30 = arith.constant 0 : index
      %44 = vector.load %arg8[%c0_29, %c0_30] : memref<1x32xf32, #tpu.memory_space<vmem>>, vector<1x32xf32>
      %45 = vector.broadcast %44 : vector<1x32xf32> to vector<8x32xf32>
      %46 = arith.addf %43, %45 : vector<8x32xf32>
      %c0_31 = arith.constant 0 : index
      %c0_32 = arith.constant 0 : index
      %47 = vector.load %arg9[%c0_31, %c0_32] : memref<8x32xf32, #tpu.memory_space<vmem>>, vector<8x32xf32>
      tpu.vector_store %arg9[%c0_31, %c0_32], %46 {strides = array<i32>} : memref<8x32xf32, #tpu.memory_space<vmem>>, vector<8x32xf32>,
    } else {
    }
    return
  }
  func.func @transform_0(%arg0: i32, %arg1: i32) -> (i32, i32) {
    %c0_i32 = arith.constant 0 : i32
    %c0_i32_0 = arith.constant 0 : i32
    return %arg0, %c0_i32 : i32, i32
  }
  func.func @transform_1(%arg0: i32, %arg1: i32) -> (i32, i32) {
    %c0_i32 = arith.constant 0 : i32
    %c0_i32_0 = arith.constant 0 : i32
    return %c0_i32, %arg1 : i32, i32
  }
  func.func @transform_2(%arg0: i32, %arg1: i32) -> (i32, i32) {
    %c0_i32 = arith.constant 0 : i32
    %c0_i32_0 = arith.constant 0 : i32
    return %c0_i32, %arg1 : i32, i32
  }
  func.func @transform_3(%arg0: i32, %arg1: i32) -> (i32, i32) {
    %c0_i32 = arith.constant 0 : i32
    %c0_i32_0 = arith.constant 0 : i32
    return %arg1, %c0_i32 : i32, i32
  }
  func.func @transform_4(%arg0: i32, %arg1: i32) -> (i32, i32) {
    %c0_i32 = arith.constant 0 : i32
    %c0_i32_0 = arith.constant 0 : i32
    %c0_i32_1 = arith.constant 0 : i32
    return %c0_i32, %c0_i32_0 : i32, i32
  }
  func.func @transform_5(%arg0: i32, %arg1: i32) -> (i32, i32) {
    %c0_i32 = arith.constant 0 : i32
    %c0_i32_0 = arith.constant 0 : i32
    %c0_i32_1 = arith.constant 0 : i32
    return %c0_i32, %c0_i32_0 : i32, i32
  }
  func.func @transform_6(%arg0: i32, %arg1: i32) -> (i32, i32) {
    %c0_i32 = arith.constant 0 : i32
    %c0_i32_0 = arith.constant 0 : i32
    %c0_i32_1 = arith.constant 0 : i32
    return %c0_i32, %c0_i32_0 : i32, i32
  }
  func.func @transform_7(%arg0: i32, %arg1: i32) -> (i32, i32) {
    %c0_i32 = arith.constant 0 : i32
    %c0_i32_0 = arith.constant 0 : i32
    return %arg0, %c0_i32 : i32, i32
  }
}

</mosaic_0001>

<bundles_post_ra>
// kernel: decoder_layer.6
= control target key start
LH: loop header
LB: loop body
LE: loop exit
PB: predicated region body
PF: predicated region fallthrough
CT: control target
= control target key end

     0   :  { %8 = vsyncpa [#allocation4], 0  ;;  %s601_s12 = smov 0   ;;  %s603_s13 = smov 0   ;;  %s666_s0 = inlined_call_operand.vmem [shape: f32[16,32], index: 0, kind: input, shape index: {}]   ;;  %s667_s1 = inlined_call_operand.hbm [shape: f32[32,96], index: 1, kind: input, shape index: {}]   ;;  %s668_s2 = inlined_call_operand.vmem [shape: f32[1,96], index: 2, kind: input, shape index: {}]   ;;  %s669_s3 = inlined_call_operand.vmem [shape: f32[16,96], index: 3, kind: output, shape index: {}]  }
   0x1   :  { %s605_s14 = smov 0  }
   0x2 LB: > { %s453_s15 = sadd.s32 4294967295, %s574_s14   ;;  %s33_s16 = sadd.s32 1, %s570_s13  ;;  %s574_s14 = sphi %s605_s14, %s14_s14   ;;  %s570_s13 = sphi %s603_s13, %s673_s13   ;;  %s566_s12 = sphi %s601_s12, %s672_s12  }
   0x3   : > { %p35_p0 = scmp.ge.s32.totalorder %s33_s16, 2  ;;  %p455_p1 = scmp.ge.s32.totalorder %s574_s14, 1 }
   0x4   : > { %p148_p2 = scmp.lt.s32.totalorder %s574_s14, 3  ;;  %p626_p4 = scmp.eq.s32.totalorder %s453_s15, 0 }
   0x5   : > { %s675_s16 = smov (%p35_p0, %s33_s16), 0  ;;  %s576_s19 = smov [#allocation3]  }
   0x6   : > { %p622_p3 = pnand %p455_p1, %p148_p2  ;;  %s164_s20 = sshll.u32 %s576_s19, 4  ;;  %s165_s20 = int_to_ptr.vmem [resolvable:$true] %s164_s20 }
   0x7   : > { %s533_s21 = scalar_lea.vmem %s165_s20, 512  ;;  %p541_p11 = scmp.lt.s32.totalorder %s165_s20, %s165_s20 }
   0x8   : > { %p487_p5 = pneg %p622_p3  ;;  %p534_p8 = scmp.ne.s32.totalorder %s165_s20, %s533_s21 }
   0x9   : > { %p542_p12 = scmp.lt.s32.totalorder %s533_s21, %s533_s21 }
   0xa   : > { %p488_p6 = pnand %p626_p4, %p487_p5 }
   0xb   : > { %p543_p13 = por %p542_p12, %p541_p11 }
   0xc   : > { %p524_p7 = pneg %p488_p6 }
   0xe   : > { %p536_p9 = pnand %p534_p8, %p524_p7 }
  0x10   : > { %p537_p10 = pneg %p536_p9 }
  0x12   : > { %p544_p0 = pnand %p543_p13, %p537_p10 }
  0x14   : > { %547 = shalt.err (!%p544_p0)
}
  0x15   : > { %s577_s22 = smov 128   ;;  %s578_s23 = smov 8  }
  0x16   : > { %490 = dma.hbm_to_vmem [thread:$0]  (!%p488_p6), %s667_s1, 512, %s165_s20, [#allocation4], %s577_s22, %s577_s22, %s578_s23  }
  0x17   : > { %196 = sbr.rel (%p622_p3) target bundleno = 244 (0xf4), region = 32 }
  0x1c   : > { %561 = dma.done.wait (%p626_p4), [#allocation4], 512  }
  0x1d   : > { %563 = vsyncadd (%p626_p4), [#allocation4], 4294966784  ;;  %p227_p1 = scmp.lt.s32.totalorder %s566_s12, 1  ;;  %v579_v0 = vmov 0.0   ;;  %vm580_vm0 = vmmov 0   ;;  %vm249_vm1 = vcmask 785408  }
  0x1e   : > { %472 = vmatprep.subr.mxu0 %v579_v0  ;;  %480 = vmatprep.mubr.msk.f32.mxu0 %vm580_vm0, %v579_v0  ;;  %250 = vst.msk [vmem:[#allocation2] sm:$0xff] %vm249_vm1, %v579_v0  ;;  %v256_v1 = vld [vmem:[#allocation3 + $0x18] sm:$0xff]  ;;  %v255_v2 = vld [vmem:[#allocation3 + $0x10] sm:$0xff]  ;;  %v254_v3 = vld [vmem:[#allocation3 + $0x8] sm:$0xff]  ;;  %vm257_vm2 = vcmask 261120  }
  0x1f   : > { %s677_s12 = smov (!%p227_p1, %s566_s12), 1  ;;  %473 = vmatpush3.msra.mxu0 %v256_v1  ;;  %v253_v4 = vld [vmem:[#allocation3] sm:$0xff]  ;;  %v464_v10 = vld [vmem:[%s668_s2] ss:$0 sm:$0xff] }
  0x20   : > { %s461_s26 = sshll.u32 %s677_s12, 3  ;;  %474 = vmatprep.subr.mxu0 %v579_v0 }
  0x21   : > { %s233_s29 = scalar_lea.vmem %s666_s0, %s461_s26  ;;  %475 = vmatpush3.msra.mxu0 %v255_v2  ;;  %s244_s7 = scalar_lea.vmem %s669_s3, %s461_s26 }
  0x22   : > { %476 = vmatprep.subr.mxu0 %v579_v0  ;;  %v252_v5 = vld [vmem:[%s233_s29] sm:$0xff] }
  0x23   : > { %477 = vmatpush3.msra.mxu0 %v254_v3 }
  0x24   : > { %478 = vmatprep.subr.mxu0 %v579_v0 }
  0x25   : > { %479 = vmatpush3.msra.mxu0 %v253_v4  ;;  %v251_v6 = vld [vmem:[#allocation2] sm:$0xff] }
  0x26   : > { %481 = vmatmul.mubr.msk.f32.vlgmr.msra.gmra.mxu0 %vm257_vm2, %v252_v5 }
  0xe6   : > { %v327_v7 = vpop.f32.mrf.mxu0 }
  0xe7   : > { %v331_v8 = vadd.f32 %v327_v7, %v251_v6 }
  0xe8   : > { %v482_v9 = vpop.f32.mrf.mxu0 }
  0xe9   : > { %333 = vst.msk [vmem:[#allocation2] sm:$0xff] %vm249_vm1, %v331_v8 }
  0xf0   : > { %v337_v11 = vld [vmem:[#allocation2] sm:$0xff] }
  0xf1   : > { %v345_v12 = vadd.f32 %v464_v10, %v337_v11 }
  0xf3   : > { %346 = vst.msk [vmem:[%s244_s7] sm:$0xff] %vm249_vm1, %v345_v12 }
  0xf4 PF: > { %s14_s14 = sadd.s32 1, %s574_s14   ;;  %s672_s12 = smov %s570_s13 }
  0xf5   : > { %p11_p2 = scmp.ge.s32.totalorder %s14_s14, 4   ;;  %s673_s13 = smov %s675_s16 }
  0xf7   :  { %13 = sbr.rel (!%p11_p2) target bundleno = 2 (0x2), region = 79 }
  0xfc   :  { %372 = vsyncpa [#allocation4], 1 }
  0xfd   :  { %374 = vsyncpa [#allocation4 + $0x1], 1 }

// kernel: decoder_layer.8
= control target key start
LH: loop header
LB: loop body
LE: loop exit
PB: predicated region body
PF: predicated region fallthrough
CT: control target
= control target key end

     0   :  { %s561_s12 = smov 0   ;;  %s563_s13 = smov 0   ;;  %s613_s0 = inlined_call_operand.vmem [shape: f32[16,32], index: 0, kind: input, shape index: {}]   ;;  %s614_s1 = inlined_call_operand.vmem [shape: f32[32,32], index: 1, kind: input, shape index: {}]   ;;  %s615_s2 = inlined_call_operand.vmem [shape: f32[1,32], index: 2, kind: input, shape index: {}]   ;;  %s616_s3 = inlined_call_operand.vmem [shape: f32[16,32], index: 3, kind: output, shape index: {}]  }
   0x1   :  { %s565_s14 = smov 0  }
   0x2 LB: > { %s32_s15 = sadd.s32 1, %s533_s13  ;;  %p466_p0 = scmp.ge.s32.totalorder %s537_s14, 1  ;;  %s537_s14 = sphi %s565_s14, %s13_s14   ;;  %s533_s13 = sphi %s563_s13, %s618_s13   ;;  %s529_s12 = sphi %s561_s12, %s617_s12  }
   0x3   : > { %p34_p1 = scmp.ge.s32.totalorder %s32_s15, 2  ;;  %p186_p2 = scmp.lt.s32.totalorder %s537_s14, 3 }
   0x5   : > { %s620_s15 = smov (%p34_p1, %s32_s15), 0  ;;  %p187_p3 = pnand %p466_p0, %p186_p2 }
   0x6   : > { %p225_p4 = scmp.lt.s32.totalorder (!%p187_p3), %s529_s12, 1 }
   0x7   : > { %190 = sbr.rel (%p187_p3) target bundleno = 227 (0xe3), region = 32 }
   0xc   : > { %v262_v0 = vld [vmem:[%s614_s1 + $0x18] sm:$0xff]  ;;  %v539_v1 = vmov 0.0   ;;  %v261_v2 = vld [vmem:[%s614_s1 + $0x10] sm:$0xff]  ;;  %vm540_vm0 = vmmov 0   ;;  %vm255_vm1 = vcmask 261120   ;;  %s622_s12 = smov (!%p225_p4, %s529_s12), 1 }
   0xd   : > { %478 = vmatprep.subr.mxu0 %v539_v1  ;;  %486 = vmatprep.mubr.msk.f32.mxu0 %vm540_vm0, %v539_v1  ;;  %256 = vst.msk [vmem:[#allocation2] sm:$0xff] %vm255_vm1, %v539_v1  ;;  %v260_v3 = vld [vmem:[%s614_s1 + $0x8] sm:$0xff]  ;;  %s467_s22 = sshll.u32 %s622_s12, 3  ;;  %v259_v4 = vld [vmem:[%s614_s1] sm:$0xff] }
   0xe   : > { %479 = vmatpush3.msra.mxu0 %v262_v0  ;;  %s231_s27 = scalar_lea.vmem %s613_s0, %s467_s22  ;;  %v470_v10 = vld [vmem:[%s615_s2] ss:$0 sm:$0xff]  ;;  %s250_s5 = scalar_lea.vmem %s616_s3, %s467_s22 }
   0xf   : > { %480 = vmatprep.subr.mxu0 %v539_v1  ;;  %v258_v5 = vld [vmem:[%s231_s27] sm:$0xff] }
  0x10   : > { %481 = vmatpush3.msra.mxu0 %v261_v2 }
  0x11   : > { %482 = vmatprep.subr.mxu0 %v539_v1 }
  0x12   : > { %483 = vmatpush3.msra.mxu0 %v260_v3 }
  0x13   : > { %484 = vmatprep.subr.mxu0 %v539_v1 }
  0x14   : > { %485 = vmatpush3.msra.mxu0 %v259_v4  ;;  %v257_v6 = vld [vmem:[#allocation2] sm:$0xff] }
  0x15   : > { %487 = vmatmul.mubr.msk.f32.vlgmr.msra.gmra.mxu0 %vm255_vm1, %v258_v5 }
  0xd5   : > { %v333_v7 = vpop.f32.mrf.mxu0 }
  0xd6   : > { %v337_v8 = vadd.f32 %v333_v7, %v257_v6 }
  0xd7   : > { %v488_v9 = vpop.f32.mrf.mxu0 }
  0xd8   : > { %338 = vst.msk [vmem:[#allocation2] sm:$0xff] %vm255_vm1, %v337_v8 }
  0xdf   : > { %v342_v11 = vld [vmem:[#allocation2] sm:$0xff] }
  0xe0   : > { %v350_v12 = vadd.f32 %v470_v10, %v342_v11 }
  0xe2   : > { %351 = vst.msk [vmem:[%s250_s5] sm:$0xff] %vm255_vm1, %v350_v12 }
  0xe3 PF: > { %s13_s14 = sadd.s32 1, %s537_s14   ;;  %s617_s12 = smov %s533_s13 }
  0xe4   : > { %p10_p5 = scmp.ge.s32.totalorder %s13_s14, 4   ;;  %s618_s13 = smov %s620_s15 }
  0xe6   :  { %12 = sbr.rel (!%p10_p5) target bundleno = 2 (0x2), region = 76 }

// kernel: decoder_layer.9
= control target key start
LH: loop header
LB: loop body
LE: loop exit
PB: predicated region body
PF: predicated region fallthrough
CT: control target
= control target key end

     0   :  { %s591_s12 = smov 0   ;;  %s593_s13 = smov 0   ;;  %s645_s0 = inlined_call_operand.vmem [shape: f32[32,32], index: 0, kind: input, shape index: {}]   ;;  %s646_s1 = inlined_call_operand.vmem [shape: f32[32,64], index: 1, kind: input, shape index: {}]   ;;  %s647_s2 = inlined_call_operand.vmem [shape: f32[1,64], index: 2, kind: input, shape index: {}]   ;;  %s648_s3 = inlined_call_operand.vmem [shape: f32[32,64], index: 3, kind: output, shape index: {}]  }
   0x1   :  { %s595_s14 = smov 0  }
   0x2 LB: > { %s32_s15 = sadd.s32 1, %s564_s13  ;;  %p494_p0 = scmp.ge.s32.totalorder %s568_s14, 1  ;;  %s568_s14 = sphi %s595_s14, %s13_s14   ;;  %s564_s13 = sphi %s593_s13, %s650_s13   ;;  %s560_s12 = sphi %s591_s12, %s649_s12  }
   0x3   : > { %p34_p1 = scmp.ge.s32.totalorder %s32_s15, 2  ;;  %p188_p2 = scmp.lt.s32.totalorder %s568_s14, 3 }
   0x5   : > { %s652_s15 = smov (%p34_p1, %s32_s15), 0  ;;  %p189_p3 = pnand %p494_p0, %p188_p2 }
   0x6   : > { %s495_s20 = sshll.u32 (!%p189_p3), %s560_s12, 1 }
   0x7   : > { %192 = sbr.rel (%p189_p3) target bundleno = 229 (0xe5), region = 32  ;;  %p230_p4 = scmp.lt.s32.totalorder (!%p189_p3), %s495_s20, 3 }
   0xc   : > { %v273_v0 = vld [vmem:[%s646_s1 + $0x18] sm:$0xff]  ;;  %v272_v1 = vld [vmem:[%s646_s1 + $0x10] sm:$0xff]  ;;  %vm263_vm0 = vcmask 523264   ;;  %v271_v2 = vld [vmem:[%s646_s1 + $0x8] sm:$0xff]  ;;  %v570_v3 = vmov 0.0   ;;  %s654_s20 = smov (!%p230_p4, %s495_s20), 3 }
   0xd   : > { %510 = vmatprep.subr.mxu0 %v273_v0  ;;  %265 = vst.msk [vmem:[#allocation2 + $0x8] sm:$0xff] %vm263_vm0, %v570_v3  ;;  %264 = vst.msk [vmem:[#allocation2] sm:$0xff] %vm263_vm0, %v570_v3  ;;  %v270_v4 = vld [vmem:[%s646_s1] sm:$0xff]  ;;  %s496_s25 = sshll.u32 %s654_s20, 3  ;;  %vm274_vm1 = vcmask 261120  }
   0xe   : > { %511 = vmatpush3.msra.mxu0 %v273_v0  ;;  %s236_s28 = scalar_lea.vmem %s645_s0, %s496_s25  ;;  %v501_v14 = vld [vmem:[%s647_s2] ss:$0 sm:$0xff]  ;;  %s257_s6 = scalar_lea.vmem %s648_s3, %s496_s25 }
   0xf   : > { %512 = vmatprep.subr.mxu0 %v272_v1  ;;  %v268_v5 = vld [vmem:[%s236_s28] sm:$0xff]  ;;  %v269_v6 = vld [vmem:[%s236_s28 + $0x8] sm:$0xff] }
  0x10   : > { %513 = vmatpush3.msra.mxu0 %v272_v1  ;;  %518 = vmatprep.mubr.msk.f32.mxu0 %vm274_vm1, %v268_v5 }
  0x11   : > { %514 = vmatprep.subr.mxu0 %v271_v2 }
  0x12   : > { %515 = vmatpush3.msra.mxu0 %v271_v2 }
  0x13   : > { %516 = vmatprep.subr.mxu0 %v270_v4 }
  0x14   : > { %517 = vmatpush3.msra.mxu0 %v270_v4  ;;  %v267_v7 = vld [vmem:[#allocation2 + $0x8] sm:$0xff]  ;;  %v266_v9 = vld [vmem:[#allocation2] sm:$0xff] }
  0x15   : > { %519 = vmatmul.mubr.msk.f32.vlgmr.msra.gmra.mxu0 %vm274_vm1, %v269_v6 }
  0xd5   : > { %v520_v8 = vpop.f32.mrf.mxu0 }
  0xd6   : > { %v357_v10 = vadd.f32 %v520_v8, %v267_v7 }
  0xd7   : > { %v347_v11 = vpop.f32.mrf.mxu0 }
  0xd8   : > { %360 = vst.msk [vmem:[#allocation2 + $0x8] sm:$0xff] %vm263_vm0, %v357_v10  ;;  %v356_v12 = vadd.f32 %v347_v11, %v266_v9 }
  0xda   : > { %359 = vst.msk [vmem:[#allocation2] sm:$0xff] %vm263_vm0, %v356_v12 }
  0xdf   : > { %v365_v13 = vld [vmem:[#allocation2 + $0x8] sm:$0xff] }
  0xe0   : > { %v374_v17 = vadd.f32 %v501_v14, %v365_v13 }
  0xe1   : > { %v364_v15 = vld [vmem:[#allocation2] sm:$0xff] }
  0xe2   : > { %v373_v16 = vadd.f32 %v501_v14, %v364_v15  ;;  %376 = vst.msk [vmem:[%s257_s6 + $0x8] sm:$0xff] %vm263_vm0, %v374_v17 }
  0xe4   : > { %375 = vst.msk [vmem:[%s257_s6] sm:$0xff] %vm263_vm0, %v373_v16 }
  0xe5 PF: > { %s13_s14 = sadd.s32 1, %s568_s14   ;;  %s649_s12 = smov %s564_s13 }
  0xe6   : > { %p10_p5 = scmp.ge.s32.totalorder %s13_s14, 4   ;;  %s650_s13 = smov %s652_s15 }
  0xe8   :  { %12 = sbr.rel (!%p10_p5) target bundleno = 2 (0x2), region = 76 }

// kernel: decoder_layer.7
= control target key start
LH: loop header
LB: loop body
LE: loop exit
PB: predicated region body
PF: predicated region fallthrough
CT: control target
= control target key end

     0   :  { %s2283_s0 = inlined_call_operand.vmem [shape: f32[2,4,8,8], index: 0, kind: input, shape index: {}]   ;;  %s2284_s1 = inlined_call_operand.vmem [shape: f32[2,4,8,8], index: 1, kind: input, shape index: {}]   ;;  %s2285_s2 = inlined_call_operand.vmem [shape: f32[2,4,8,8], index: 2, kind: input, shape index: {}]   ;;  %s2286_s3 = inlined_call_operand.vmem [shape: f32[2,8,8], index: 3, kind: input, shape index: {}]   ;;  %s2287_s4 = inlined_call_operand.vmem [shape: f32[4,8,32], index: 4, kind: input, shape index: {}]   ;;  %s2288_s5 = inlined_call_operand.vmem [shape: f32[1,32], index: 5, kind: input, shape index: {}]   ;;  %s2289_s6 = inlined_call_operand.vmem [shape: f32[2,8,32], index: 6, kind: input, shape index: {}]   ;;  %s2290_s7 = inlined_call_operand.vmem [shape: f32[1,32], index: 7, kind: input, shape index: {}]   ;;  %s2291_s8 = inlined_call_operand.vmem [shape: f32[1,32], index: 8, kind: input, shape index: {}]   ;;  %s2292_s9 = inlined_call_operand.vmem [shape: f32[2,8,32], index: 9, kind: output, shape index: {0}]   ;;  %s2293_s10 = inlined_call_operand.hbm [shape: f32[2,4,8,8], index: 10, kind: output, shape index: {1}]  }
   0x1   :  { %2294 = sst [smem:[#allocation5_spill]] %s2283_s0 }
   0x2   :  { %2295 = sst [smem:[#allocation6_spill]] %s2284_s1 }
   0x3   :  { %16 = vsyncpa [#allocation3], 0 }
   0x4   :  { %18 = vsyncpa [#allocation3 + $0x1], 0  ;;  %s2037_s13 = smov 0   ;;  %s2039_s14 = smov 0  }
   0x5   :  { %s2041_s15 = smov 0   ;;  %s2043_s16 = smov 0  }
   0x6   :  { %s2045_s17 = smov 0   ;;  %s2047_s18 = smov 0  }
   0x7 LB: > { %s1695_s19 = sadd.s32 4294967295, %s1975_s18   ;;  %s1696_s20 = sadd.s32 4294967294, %s1975_s18   ;;  %s1975_s18 = sphi %s2047_s18, %s24_s18   ;;  %s1971_s17 = sphi %s2045_s17, %s2304_s17   ;;  %s1967_s16 = sphi %s2043_s16, %s2303_s16   ;;  %s1963_s15 = sphi %s2041_s15, %s2302_s15   ;;  %s1959_s14 = sphi %s2039_s14, %s2301_s14   ;;  %s1955_s13 = sphi %s2037_s13, %s2300_s13  }
   0x8   : > { %s36_s21 = sadd.s32 1, %s1971_s17  ;;  %s293_s22 = sadd.s32 1, %s1963_s15 }
   0x9   : > { %p38_p0 = scmp.ge.s32.totalorder %s36_s21, 2  ;;  %p303_p1 = scmp.ne.s32.totalorder %s1963_s15, %s1959_s14 }
   0xa   : > { %p304_p2 = scmp.eq.s32.totalorder %s1695_s19, 1  ;;  %p309_p3 = scmp.ne.s32.totalorder %s1959_s14, %s1955_s13 }
   0xb   : > { %s2306_s21 = smov (%p38_p0, %s36_s21), 0  ;;  %p310_p5 = scmp.eq.s32.totalorder %s1696_s20, 1 }
   0xc   : > { %p2077_p4 = por %p304_p2, %p303_p1  ;;  %s288_s24 = ssub.s32 %s1971_s17, %s2306_s21 }
   0xd   : > { %p1699_p6 = scmp.ge.s32.totalorder %s1975_s18, 1  ;;  %p291_p7 = scmp.eq.s32.totalorder %s288_s24, 0 }
   0xe   : > { %p2084_p8 = por %p310_p5, %p309_p3  ;;  %p387_p9 = scmp.lt.s32.totalorder %s1975_s18, 3 }
   0xf   : > { %s2090_s26 = scalar_select %p291_p7, %s1963_s15, %s293_s22  }
  0x10   : > { %p388_p10 = pnand %p1699_p6, %p387_p9 }
  0x11   : > { %p459_p11 = scmp.lt.s32.totalorder (!%p388_p10), %s1967_s16, 1  ;;  %s2298_s1 = sld [smem:[#allocation6_spill]] (!%p388_p10) }
  0x12   : > { %391 = sbr.rel (%p388_p10) target bundleno = 1250 (0x4e2), region = 56  ;;  %s2299_s0 = sld [smem:[#allocation5_spill]] (!%p388_p10) }
  0x13   : > { %s456_s19 = sand.u32 (!%p388_p10), 1, %s1959_s14  }
  0x17   : > { %v1977_v0 = vmov 0.0   ;;  %s2096_s27 = scalar_select %p459_p11, %s1967_s16, 1  ;;  %vm1978_vm0 = vmmov 0   ;;  %vm510_vm1 = vcmask 64512   ;;  %vm1475_vm3 = vcmask 261120  }
  0x18   : > { %1762 = vmatprep.subr.mxu0 %v1977_v0  ;;  %1767 = vmatprep.subr.mxu1 %v1977_v0 }
  0x19   : > { %1764 = vmatprep.mubr.msk.f32.mxu0 %vm1978_vm0, %v1977_v0  ;;  %1769 = vmatprep.mubr.msk.f32.mxu1 %vm1978_vm0, %v1977_v0  ;;  %s2103_s28 = sshll.u32 %s2096_s27, 5  ;;  %s2134_s22 = sshll.u32 %s2096_s27, 3 }
  0x1a   : > { %s471_s11 = scalar_lea.vmem %s2298_s1, %s2103_s28  ;;  %s466_s20 = scalar_lea.vmem %s2299_s0, %s2103_s28 }
  0x1b   : > { %v502_v1 = vld [vmem:[%s471_s11] sm:$0xff]  ;;  %v503_v2 = vld [vmem:[%s471_s11 + $0x8] sm:$0xff]  ;;  %v504_v5 = vld [vmem:[%s471_s11 + $0x10] sm:$0xff]  ;;  %s483_s30 = scalar_lea.vmem %s2286_s3, %s2134_s22  ;;  %s476_s12 = scalar_lea.vmem %s2285_s2, %s2103_s28 }
  0x1c   : > { %1763 = vmatpush3.xpose.msk.msra.mxu0 %vm510_vm1, %v502_v1  ;;  %1768 = vmatpush3.xpose.msk.msra.mxu1 %vm510_vm1, %v503_v2  ;;  %v498_v3 = vld [vmem:[%s466_s20] sm:$0xff]  ;;  %v499_v4 = vld [vmem:[%s466_s20 + $0x8] sm:$0xff]  ;;  %v505_v6 = vld [vmem:[%s471_s11 + $0x18] sm:$0xff]  ;;  %s1700_s28 = sshll.u32 %s456_s19, 5  ;;  %s490_s27 = scalar_lea.vmem %s2289_s6, %s2134_s22 }
  0x1d   : > { %1772 = vmatprep.subr.mxu0 %v1977_v0  ;;  %1777 = vmatprep.subr.mxu1 %v1977_v0  ;;  %v500_v7 = vld [vmem:[%s466_s20 + $0x10] sm:$0xff]  ;;  %v501_v8 = vld [vmem:[%s466_s20 + $0x18] sm:$0xff]  ;;  %v819_v9 = vld [vmem:[%s483_s30] sm:$0xff]  ;;  %s2161_s20 = scalar_lea.vmem [#allocation2], %s1700_s28  ;;  %s1737_s28 = sshll.u32 %s1967_s16, 9 }
  0x1e   : > { %vm820_vm2 = vcmp.ne.f32.partialorder %v819_v9, 0.0  ;;  %v506_v50 = vld [vmem:[%s476_s12] sm:$0xff]  ;;  %v507_v51 = vld [vmem:[%s476_s12 + $0x8] sm:$0xff]  ;;  %v508_v58 = vld [vmem:[%s476_s12 + $0x10] sm:$0xff]  ;;  %s1532_s24 = sshll.u32 %s2161_s20, 4  ;;  %s2227_s11 = scalar_lea.sflag [#allocation3], %s456_s19  ;;  %s2223_s24 = int_to_ptr.vmem [resolvable:$true] %s1532_s24 }
  0x1f   : > { %1765 = vmatmul.mubr.msk.f32.vlgmr.msra.gmra.mxu0 %vm510_vm1, %v498_v3  ;;  %1770 = vmatmul.mubr.msk.f32.vlgmr.msra.gmra.mxu1 %vm510_vm1, %v499_v4  ;;  %v509_v62 = vld [vmem:[%s476_s12 + $0x18] sm:$0xff]  ;;  %v1167_v3 = vld [vmem:[%s2287_s4] sm:$0xff]  ;;  %v1168_v4 = vld [vmem:[%s2287_s4 + $0x8] sm:$0xff]  ;;  %s1899_s12 = scalar_lea.vmem %s2223_s24, 512  ;;  %s1979_s16 = smov [#allocation2]  }
  0x20   : > { %1773 = vmatpush3.xpose.msk.msra.mxu0 %vm510_vm1, %v504_v5  ;;  %1774 = vmatprep.mubr.msk.f32.mxu0 %vm1978_vm0, %v1977_v0  ;;  %v1170_v5 = vld [vmem:[%s2287_s4 + $0x18] sm:$0xff]  ;;  %p1900_p12 = scmp.ne.s32.totalorder %s2223_s24, %s1899_s12 }
  0x21   : > { %1778 = vmatpush3.xpose.msk.msra.mxu1 %vm510_vm1, %v505_v6  ;;  %1779 = vmatprep.mubr.msk.f32.mxu1 %vm1978_vm0, %v1977_v0 }
  0x22   : > { %1782 = vmatprep.subr.mxu0 %v1977_v0  ;;  %1787 = vmatprep.subr.mxu1 %v1977_v0  ;;  %p1901_p13 = pnand %p1900_p12, %p2077_p4 }
  0x23   : > { %1775 = vmatmul.mubr.msk.f32.vlgmr.msra.gmra.mxu0 %vm510_vm1, %v500_v7 }
  0x24   : > { %1780 = vmatmul.mubr.msk.f32.vlgmr.msra.gmra.mxu1 %vm510_vm1, %v501_v8  ;;  %1784 = vmatprep.mubr.msk.f32.mxu0 %vm1978_vm0, %v1977_v0  ;;  %v1169_v8 = vld [vmem:[%s2287_s4 + $0x10] sm:$0xff]  ;;  %p1902_p0 = pneg %p1901_p13 }
  0x25   : > { %1789 = vmatprep.mubr.msk.f32.mxu1 %vm1978_vm0, %v1977_v0  ;;  %1783 = vmatpush3.msra.mxu0 %v506_v50 }
  0x26   : > { %1792 = vmatprep.subr.mxu0 %v1977_v0  ;;  %1788 = vmatpush3.msra.mxu1 %v507_v51 }
  0x27   : > { %1797 = vmatprep.subr.mxu1 %v1977_v0 }
  0xdf   : > { %v583_v10 = vpop.f32.mrf.mxu0  ;;  %v659_v11 = vpop.f32.mrf.mxu1 }
  0xe0   : > { %v815_v12 = vmul.f32 0.35355338, %v583_v10  ;;  %v816_v13 = vmul.f32 0.35355338, %v659_v11 }
  0xe1   : > { %v1766_v14 = vpop.f32.mrf.mxu0  ;;  %v1771_v15 = vpop.f32.mrf.mxu1 }
  0xe2   : > { %v823_v16 = vsel %vm820_vm2, %v815_v12, -1e+09  ;;  %v824_v17 = vsel %vm820_vm2, %v816_v13, -1e+09 }
  0xe3   : > { %v735_v18 = vpop.f32.mrf.mxu0  ;;  %v827_v19 = vsel %vm510_vm1, %v823_v16, -inf  ;;  %v830_v24 = vsel %vm510_vm1, %v824_v17, -inf }
  0xe4   : > { %v817_v20 = vmul.f32 0.35355338, %v735_v18  ;;  %828 = vmax.xlane.f32.xlu0 %v827_v19  ;;  %v811_v21 = vpop.f32.mrf.mxu1 }
  0xe5   : > { %v1776_v22 = vpop.f32.mrf.mxu0  ;;  %v818_v23 = vmul.f32 0.35355338, %v811_v21 }
  0xe6   : > { %v825_v25 = vsel %vm820_vm2, %v817_v20, -1e+09  ;;  %v1781_v26 = vpop.f32.mrf.mxu1 }
  0xe7   : > { %v833_v27 = vsel %vm510_vm1, %v825_v25, -inf  ;;  %v826_v28 = vsel %vm820_vm2, %v818_v23, -1e+09  ;;  %v1473_v26 = vld [vmem:[%s490_s27] sm:$0xff]  ;;  %s2221_s27 = scalar_lea.hbm %s2293_s10, %s1737_s28 }
  0xe8   : > { %831 = vmax.xlane.f32.xlu0 %v830_v24  ;;  %834 = vmax.xlane.f32.xlu1 %v833_v27  ;;  %v836_v29 = vsel %vm510_vm1, %v826_v28, -inf }
  0xec   : > { %837 = vmax.xlane.f32.xlu1 %v836_v29 }
 0x16d   : > { %v829_v30 = vpop.xlane.xlu0 %828 }
 0x16e   : > { %v839_v31 = vsub.f32 %v823_v16, %v829_v30 }
 0x170   : > { %v843_v32 = vmul.f32 1.442695, %v839_v31 }
 0x171   : > { %v832_v33 = vpop.xlane.xlu0 %831  ;;  %v835_v34 = vpop.xlane.xlu1 %834 }
 0x172   : > { %1881 = vpow2.f32 %v843_v32  ;;  %v840_v35 = vsub.f32 %v824_v17, %v832_v33  ;;  %v841_v36 = vsub.f32 %v825_v25, %v835_v34 }
 0x174   : > { %v845_v37 = vmul.f32 1.442695, %v840_v35  ;;  %v847_v38 = vmul.f32 1.442695, %v841_v36 }
 0x175   : > { %v838_v39 = vpop.xlane.xlu1 %837 }
 0x176   : > { %1883 = vpow2.f32 %v845_v37  ;;  %v842_v40 = vsub.f32 %v826_v28, %v838_v39 }
 0x177   : > { %1885 = vpow2.f32 %v847_v38 }
 0x178   : > { %v849_v41 = vmul.f32 1.442695, %v842_v40 }
 0x17a   : > { %1887 = vpow2.f32 %v849_v41 }
 0x17f   : > { %v1882_v42 = vpop.eup %1881 }
 0x180   : > { %v851_v43 = vsel %vm510_vm1, %v1882_v42, 0.0 }
 0x181   : > { %852 = vadd.xlane.f32.xlu0 %v851_v43 }
 0x183   : > { %v1884_v44 = vpop.eup %1883 }
 0x184   : > { %v1886_v45 = vpop.eup %1885  ;;  %v854_v46 = vsel %vm510_vm1, %v1884_v44, 0.0 }
 0x185   : > { %855 = vadd.xlane.f32.xlu1 %v854_v46  ;;  %v857_v47 = vsel %vm510_vm1, %v1886_v45, 0.0 }
 0x186   : > { %858 = vadd.xlane.f32.xlu0 %v857_v47 }
 0x187   : > { %v1888_v48 = vpop.eup %1887 }
 0x188   : > { %v860_v49 = vsel %vm510_vm1, %v1888_v48, 0.0 }
 0x189   : > { %861 = vadd.xlane.f32.xlu1 %v860_v49 }
 0x20a   : > { %v853_v52 = vpop.xlane.xlu0 %852 }
 0x20b   : > { %1889 = vrcp.f32 %v853_v52 }
 0x20e   : > { %v856_v53 = vpop.xlane.xlu1 %855 }
 0x20f   : > { %v859_v54 = vpop.xlane.xlu0 %858  ;;  %1891 = vrcp.f32 %v856_v53 }
 0x210   : > { %1893 = vrcp.f32 %v859_v54 }
 0x212   : > { %v862_v55 = vpop.xlane.xlu1 %861 }
 0x213   : > { %1895 = vrcp.f32 %v862_v55 }
 0x218   : > { %v1890_v56 = vpop.eup %1889 }
 0x219   : > { %v867_v57 = vmul.f32 %v1890_v56, %v1882_v42 }
 0x21b   : > { %871 = vst.msk [vmem:[%s2161_s20] sm:$0xff] %vm510_vm1, %v867_v57  ;;  %1785 = vmatmul.mubr.msk.f32.vlgmr.msra.gmra.mxu0 %vm510_vm1, %v867_v57 }
 0x21c   : > { %v1892_v59 = vpop.eup %1891  ;;  %1793 = vmatpush3.msra.mxu0 %v508_v58  ;;  %1794 = vmatprep.mubr.msk.f32.mxu0 %vm1978_vm0, %v1977_v0 }
 0x21d   : > { %v1894_v60 = vpop.eup %1893  ;;  %v868_v61 = vmul.f32 %v1892_v59, %v1884_v44  ;;  %1802 = vmatprep.subr.mxu0 %v1977_v0 }
 0x21e   : > { %v869_v63 = vmul.f32 %v1894_v60, %v1886_v45 }
 0x21f   : > { %872 = vst.msk [vmem:[%s2161_s20 + $0x8] sm:$0xff] %vm510_vm1, %v868_v61  ;;  %1790 = vmatmul.mubr.msk.f32.vlgmr.msra.gmra.mxu1 %vm510_vm1, %v868_v61 }
 0x220   : > { %v1896_v1 = vpop.eup %1895  ;;  %873 = vst.msk [vmem:[%s2161_s20 + $0x10] sm:$0xff] %vm510_vm1, %v869_v63  ;;  %1795 = vmatmul.mubr.msk.f32.vlgmr.msra.gmra.mxu0 %vm510_vm1, %v869_v63  ;;  %1798 = vmatpush3.msra.mxu1 %v509_v62 }
 0x221   : > { %1799 = vmatprep.mubr.msk.f32.mxu1 %vm1978_vm0, %v1977_v0  ;;  %v870_v2 = vmul.f32 %v1896_v1, %v1888_v48  ;;  %1807 = vmatprep.subr.mxu1 %v1977_v0 }
 0x222   : > { %1804 = vmatprep.mubr.msk.f32.mxu0 %vm1978_vm0, %v1977_v0  ;;  %1803 = vmatpush3.msra.mxu0 %v1168_v4 }
 0x223   : > { %874 = vst.msk [vmem:[%s2161_s20 + $0x18] sm:$0xff] %vm510_vm1, %v870_v2  ;;  %1800 = vmatmul.mubr.msk.f32.vlgmr.msra.gmra.mxu1 %vm510_vm1, %v870_v2  ;;  %1812 = vmatprep.subr.mxu0 %v1977_v0  ;;  %s1903_s20 = sshll.u32 %s1979_s16, 4  ;;  %s1904_s20 = int_to_ptr.vmem [resolvable:$false] %s1903_s20 }
 0x224   : > { %1809 = vmatprep.mubr.msk.f32.mxu1 %vm1978_vm0, %v1977_v0  ;;  %1808 = vmatpush3.msra.mxu1 %v1167_v3  ;;  %s1905_s0 = scalar_lea.vmem %s1904_s20, 1024  ;;  %p1906_p1 = scmp.lt.s32.totalorder %s2223_s24, %s1904_s20 }
 0x225   : > { %1817 = vmatprep.subr.mxu1 %v1977_v0  ;;  %p1907_p2 = scmp.lt.s32.totalorder %s1905_s0, %s1899_s12 }
 0x227   : > { %p1908_p3 = por %p1907_p2, %p1906_p1 }
 0x229   : > { %p1909_p5 = pnand %p1908_p3, %p1902_p0 }
 0x2db   : > { %v944_v6 = vpop.f32.mrf.mxu0 }
 0x2dc   : > { %1810 = vmatmul.mubr.msk.f32.vlgmr.msra.gmra.mxu1 %vm510_vm1, %v944_v6 }
 0x2dd   : > { %v1786_v7 = vpop.f32.mrf.mxu0  ;;  %1818 = vmatpush3.msra.mxu1 %v1170_v5  ;;  %1819 = vmatprep.mubr.msk.f32.mxu1 %vm1978_vm0, %v1977_v0 }
 0x2df   : > { %v1017_v9 = vpop.f32.mrf.mxu1 }
 0x2e0   : > { %v1090_v10 = vpop.f32.mrf.mxu0  ;;  %1805 = vmatmul.mubr.msk.f32.vlgmr.msra.gmra.mxu0 %vm510_vm1, %v1017_v9 }
 0x2e1   : > { %1813 = vmatpush3.msra.mxu0 %v1169_v8  ;;  %v1791_v11 = vpop.f32.mrf.mxu1  ;;  %1814 = vmatprep.mubr.msk.f32.mxu0 %vm1978_vm0, %v1977_v0  ;;  %v1726_v0 = vld [vmem:[%s2288_s5] ss:$0 sm:$0xff] }
 0x2e2   : > { %v1796_v12 = vpop.f32.mrf.mxu0 }
 0x2e3   : > { %v1163_v13 = vpop.f32.mrf.mxu1 }
 0x2e4   : > { %1815 = vmatmul.mubr.msk.f32.vlgmr.msra.gmra.mxu0 %vm510_vm1, %v1090_v10  ;;  %1820 = vmatmul.mubr.msk.f32.vlgmr.msra.gmra.mxu1 %vm510_vm1, %v1163_v13 }
 0x2e5   : > { %v1801_v14 = vpop.f32.mrf.mxu1 }
 0x39c   : > { %v1313_v15 = vpop.f32.mrf.mxu1 }
 0x39e   : > { %v1811_v16 = vpop.f32.mrf.mxu1 }
 0x3a0   : > { %v1240_v17 = vpop.f32.mrf.mxu0 }
 0x3a1   : > { %v1314_v19 = vadd.f32 %v1313_v15, %v1240_v17 }
 0x3a2   : > { %v1806_v18 = vpop.f32.mrf.mxu0 }
 0x3a4   : > { %v1386_v20 = vpop.f32.mrf.mxu0  ;;  %v1460_v21 = vpop.f32.mrf.mxu1 }
 0x3a5   : > { %v1390_v22 = vadd.f32 %v1386_v20, %v1314_v19 }
 0x3a6   : > { %v1816_v23 = vpop.f32.mrf.mxu0  ;;  %v1821_v24 = vpop.f32.mrf.mxu1 }
 0x3a7   : > { %v1464_v25 = vadd.f32 %v1460_v21, %v1390_v22 }
 0x3a9   : > { %v1472_v27 = vadd.f32 %v1726_v0, %v1464_v25 }
 0x3ab   : > { %v1474_v28 = vadd.f32 %v1473_v26, %v1472_v27 }
 0x3ad   : > { %v1476_v29 = vsel %vm1475_vm3, %v1474_v28, 0.0 }
 0x3ae   : > { %1477 = vadd.xlane.f32.xlu0 %v1476_v29 }
 0x437   : > { %v1478_v30 = vpop.xlane.xlu0 %1477 }
 0x438   : > { %v1480_v31 = vmul.f32 0.03125, %v1478_v30 }
 0x43a   : > { %v1481_v32 = vsub.f32 %v1474_v28, %v1480_v31 }
 0x43c   : > { %v1482_v33 = vmul.f32 %v1481_v32, %v1481_v32 }
 0x43e   : > { %v1483_v34 = vsel %vm1475_vm3, %v1482_v33, 0.0 }
 0x43f   : > { %1484 = vadd.xlane.f32.xlu1 %v1483_v34 }
 0x440   : > { %1912 = shalt.err (!%p1909_p5)
}
 0x441   : > { %s1913_s19 = scalar_lea.hbm %s2221_s27, 512  ;;  %s1917_s30 = scalar_lea.hbm %s2293_s10, 1024 }
 0x442   : > { %p1914_p6 = scmp.ne.s32.totalorder %s2221_s27, %s1913_s19  ;;  %p1918_p10 = scmp.lt.s32.totalorder %s2221_s27, %s2293_s10 }
 0x443   : > { %p1919_p11 = scmp.lt.s32.totalorder %s1917_s30, %s1913_s19 }
 0x444   : > { %p1915_p7 = pnand %p1914_p6, %p2077_p4 }
 0x445   : > { %p1920_p12 = por %p1919_p11, %p1918_p10 }
 0x446   : > { %p1916_p9 = pneg %p1915_p7 }
 0x448   : > { %p1921_p13 = pnand %p1920_p12, %p1916_p9 }
 0x44a   : > { %1924 = shalt.err (!%p1921_p13)
}
 0x44b   : > { %s1980_s0 = smov 128   ;;  %s1981_s12 = smov 8   ;;  %v1727_v39 = vld [vmem:[%s2290_s7] ss:$0 sm:$0xff] }
 0x44c   : > { %1822 = dma.vmem_to_hbm [thread:$0]  (%p2077_p4), %s2223_s24, 512, %s2221_s27, %s2227_s11, %s1980_s0, %s1980_s0, %s1981_s12  }
 0x44d   : > { %v1728_v41 = vld [vmem:[%s2291_s8] ss:$0 sm:$0xff]  ;;  %s497_s23 = scalar_lea.vmem %s2292_s9, %s2134_s22 }
 0x4c8   : > { %v1485_v35 = vpop.xlane.xlu1 %1484 }
 0x4c9   : > { %v1486_v36 = vmul.f32 0.03125, %v1485_v35 }
 0x4cb   : > { %v1487_v37 = vadd.f32 1e-05, %v1486_v36 }
 0x4cd   : > { %1897 = vrsqrt.f32 %v1487_v37 }
 0x4da   : > { %v1898_v38 = vpop.eup %1897 }
 0x4db   : > { %v1489_v40 = vmul.f32 %v1898_v38, %v1481_v32 }
 0x4dd   : > { %v1497_v42 = vmul.f32 %v1727_v39, %v1489_v40 }
 0x4df   : > { %v1505_v43 = vadd.f32 %v1728_v41, %v1497_v42 }
 0x4e1   : > { %1506 = vst.msk [vmem:[%s497_s23] sm:$0xff] %vm1475_vm3, %v1505_v43 }
 0x4e2 PF: > { %p1828_p4 = scmp.ge.s32.totalorder %s1975_s18, 2  ;;  %s1557_s24 = sand.u32 1, %s1955_s13  }
 0x4e3   : > { %s1558_s27 = scalar_lea.sflag [#allocation3], %s1557_s24 }
 0x4e4   : > { %p1825_p0 = pnand %p1828_p4, %p2084_p8 }
 0x4e6   : > { %p1826_p1 = pneg %p1825_p0 }
 0x4e8   : > { %1950 = dma.done.wait (%p1826_p1), %s1558_s27, 512  }
 0x4e9   : > { %1952 = vsyncadd (%p1826_p1), %s1558_s27, 4294966784  ;;  %s24_s18 = sadd.s32 1, %s1975_s18   ;;  %s2300_s13 = smov %s1959_s14 }
 0x4ea   : > { %p21_p2 = scmp.ge.s32.totalorder %s24_s18, 4   ;;  %s2301_s14 = smov %s1963_s15 }
 0x4eb   : > { %s2302_s15 = smov %s2090_s26  ;;  %s2303_s16 = smov %s1971_s17 }
 0x4ec   : > { %s2304_s17 = smov %s2306_s21  ;;  %23 = sbr.rel (!%p21_p2) target bundleno = 7 (0x7), region = 115 }
 0x4f1   :  { %1563 = vsyncpa [#allocation3], 1 }
 0x4f2   :  { %1565 = vsyncpa [#allocation3 + $0x1], 1 }

// kernel: decoder_layer.11
= control target key start
LH: loop header
LB: loop body
LE: loop exit
PB: predicated region body
PF: predicated region fallthrough
CT: control target
= control target key end

     0   :  { %12 = vsyncpa [#allocation4], 0  ;;  %s1084_s0 = inlined_call_operand.vmem [shape: f32[16,32], index: 0, kind: input, shape index: {}]   ;;  %s1085_s1 = inlined_call_operand.vmem [shape: f32[32,64], index: 1, kind: input, shape index: {}]   ;;  %s1086_s2 = inlined_call_operand.vmem [shape: f32[1,64], index: 2, kind: input, shape index: {}]   ;;  %s1087_s3 = inlined_call_operand.vmem [shape: f32[64,32], index: 3, kind: input, shape index: {}]   ;;  %s1088_s4 = inlined_call_operand.vmem [shape: f32[1,32], index: 4, kind: input, shape index: {}]   ;;  %s1089_s5 = inlined_call_operand.vmem [shape: f32[1,32], index: 5, kind: input, shape index: {}]   ;;  %s1090_s6 = inlined_call_operand.vmem [shape: f32[1,32], index: 6, kind: input, shape index: {}]   ;;  %s1091_s7 = inlined_call_operand.hbm [shape: f32[16,32], index: 7, kind: output, shape index: {}]  }
   0x1   :  { %14 = vsyncpa [#allocation4 + $0x1], 0  ;;  %s929_s24 = smov 0   ;;  %s931_s25 = smov 0  }
   0x2   :  { %s933_s26 = smov 0   ;;  %s935_s27 = smov 0  }
   0x3   :  { %s937_s28 = smov 0   ;;  %s939_s29 = smov 0  }
   0x4 LB: > { %s685_s30 = sadd.s32 4294967295, %s884_s29   ;;  %s686_s8 = sadd.s32 4294967294, %s884_s29   ;;  %s884_s29 = sphi %s939_s29, %s20_s29   ;;  %s880_s28 = sphi %s937_s28, %s1098_s28   ;;  %s876_s27 = sphi %s935_s27, %s1097_s27   ;;  %s872_s26 = sphi %s933_s26, %s1096_s26   ;;  %s868_s25 = sphi %s931_s25, %s1095_s25   ;;  %s864_s24 = sphi %s929_s24, %s1094_s24  }
   0x5   : > { %s32_s9 = sadd.s32 1, %s880_s28  ;;  %s206_s10 = sadd.s32 1, %s872_s26 }
   0x6   : > { %p34_p0 = scmp.ge.s32.totalorder %s32_s9, 2  ;;  %p216_p1 = scmp.ne.s32.totalorder %s872_s26, %s868_s25 }
   0x7   : > { %p217_p2 = scmp.eq.s32.totalorder %s685_s30, 1  ;;  %p222_p3 = scmp.ne.s32.totalorder %s868_s25, %s864_s24 }
   0x8   : > { %s1100_s9 = smov (%p34_p0, %s32_s9), 0  ;;  %p223_p5 = scmp.eq.s32.totalorder %s686_s8, 1 }
   0x9   : > { %p969_p4 = por %p217_p2, %p216_p1  ;;  %s203_s12 = ssub.s32 %s880_s28, %s1100_s9 }
   0xa   : > { %p692_p6 = scmp.ge.s32.totalorder %s884_s29, 1  ;;  %p204_p7 = scmp.eq.s32.totalorder %s203_s12, 0 }
   0xb   : > { %p976_p8 = por %p223_p5, %p222_p3  ;;  %p279_p9 = scmp.lt.s32.totalorder %s884_s29, 3 }
   0xc   : > { %s982_s14 = scalar_select %p204_p7, %s872_s26, %s206_s10  }
   0xd   : > { %p280_p10 = pnand %p692_p6, %p279_p9 }
   0xe   : > { %p322_p11 = scmp.lt.s32.totalorder (!%p280_p10), %s876_s27, 1  ;;  %s702_s15 = sshll.u32 (!%p280_p10), %s876_s27, 7 }
   0xf   : > { %283 = sbr.rel (%p280_p10) target bundleno = 754 (0x2f2), region = 48  ;;  %s888_s8 = smov (!%p280_p10), [#allocation3]  }
  0x14   : > { %v349_v0 = vld [vmem:[%s1085_s1 + $0x18] sm:$0xff]  ;;  %v886_v1 = vmov 0.0   ;;  %v348_v2 = vld [vmem:[%s1085_s1 + $0x10] sm:$0xff]  ;;  %vm887_vm0 = vmmov 0   ;;  %vm343_vm1 = vcmask 261120   ;;  %s323_s21 = scalar_select %p322_p11, %s876_s27, 1 }
  0x15   : > { %719 = vmatprep.subr.mxu0 %v886_v1  ;;  %727 = vmatprep.mubr.msk.f32.mxu0 %vm887_vm0, %v886_v1  ;;  %v440_v3 = vld [vmem:[%s1087_s3 + $0x38] sm:$0xff]  ;;  %344 = vst.msk [vmem:[#allocation2] sm:$0xff] %vm343_vm1, %v886_v1  ;;  %v439_v4 = vld [vmem:[%s1087_s3 + $0x30] sm:$0xff]  ;;  %v347_v5 = vld [vmem:[%s1085_s1 + $0x8] sm:$0xff]  ;;  %vm441_vm2 = vcmask 523264  }
  0x16   : > { %720 = vmatpush3.msra.mxu0 %v349_v0  ;;  %730 = vmatprep.subr.mxu1 %v886_v1  ;;  %s694_s10 = sshll.u32 %s323_s21, 3  ;;  %v438_v6 = vld [vmem:[%s1087_s3 + $0x28] sm:$0xff]  ;;  %v346_v7 = vld [vmem:[%s1085_s1] sm:$0xff]  ;;  %v436_v10 = vld [vmem:[%s1087_s3 + $0x18] sm:$0xff]  ;;  %s319_s21 = sand.u32 1, %s868_s25  }
  0x17   : > { %721 = vmatprep.subr.mxu0 %v886_v1  ;;  %731 = vmatpush3.msra.mxu1 %v440_v3  ;;  %s325_s20 = scalar_lea.vmem %s1084_s0, %s694_s10  ;;  %v437_v9 = vld [vmem:[%s1087_s3 + $0x20] sm:$0xff]  ;;  %v435_v11 = vld [vmem:[%s1087_s3 + $0x10] sm:$0xff]  ;;  %v434_v12 = vld [vmem:[%s1087_s3 + $0x8] sm:$0xff]  ;;  %s693_s23 = sshll.u32 %s319_s21, 3 }
  0x18   : > { %722 = vmatpush3.msra.mxu0 %v348_v2  ;;  %732 = vmatprep.subr.mxu1 %v886_v1  ;;  %v345_v8 = vld [vmem:[%s325_s20] sm:$0xff]  ;;  %s321_s16 = scalar_lea.vmem [#allocation3], %s693_s23  ;;  %s574_s20 = scalar_lea.hbm %s1091_s7, %s702_s15 }
  0x19   : > { %723 = vmatprep.subr.mxu0 %v886_v1  ;;  %733 = vmatpush3.msra.mxu1 %v439_v4  ;;  %v433_v13 = vld [vmem:[%s1087_s3] sm:$0xff]  ;;  %s576_s17 = sshll.u32 %s321_s16, 4  ;;  %s563_s22 = scalar_lea.sflag [#allocation4], %s319_s21  ;;  %s577_s17 = int_to_ptr.vmem [resolvable:$true] %s576_s17 }
  0x1a   : > { %724 = vmatpush3.msra.mxu0 %v347_v5  ;;  %734 = vmatprep.subr.mxu1 %v886_v1  ;;  %v695_v14 = vld [vmem:[%s1086_s2] ss:$0 sm:$0xff]  ;;  %s808_s30 = scalar_lea.vmem %s577_s17, 128  ;;  %s812_s10 = sshll.u32 %s888_s8, 4  ;;  %s813_s10 = int_to_ptr.vmem [resolvable:$false] %s812_s10 }
  0x1b   : > { %725 = vmatprep.subr.mxu0 %v886_v1  ;;  %735 = vmatpush3.msra.mxu1 %v438_v6  ;;  %v698_v23 = vld [vmem:[%s1088_s4] ss:$0 sm:$0xff]  ;;  %p809_p12 = scmp.ne.s32.totalorder %s577_s17, %s808_s30  ;;  %s814_s27 = scalar_lea.vmem %s813_s10, 256 }
  0x1c   : > { %726 = vmatpush3.msra.mxu0 %v346_v7  ;;  %736 = vmatprep.subr.mxu1 %v886_v1  ;;  %v432_v19 = vld [vmem:[#allocation2] sm:$0xff]  ;;  %p815_p1 = scmp.lt.s32.totalorder %s577_s17, %s813_s10  ;;  %p816_p2 = scmp.lt.s32.totalorder %s814_s27, %s808_s30 }
  0x1d   : > { %728 = vmatmul.mubr.msk.f32.vlgmr.msra.gmra.mxu0 %vm343_vm1, %v345_v8  ;;  %737 = vmatpush3.msra.mxu1 %v437_v9  ;;  %v699_v37 = vld [vmem:[%s1089_s5] ss:$0 sm:$0xff]  ;;  %p810_p13 = pnand %p809_p12, %p969_p4 }
  0x1e   : > { %738 = vmatprep.subr.mxu1 %v886_v1  ;;  %746 = vmatprep.mubr.msk.f32.mxu1 %vm887_vm0, %v886_v1  ;;  %v700_v39 = vld [vmem:[%s1090_s6] ss:$0 sm:$0xff]  ;;  %p817_p3 = por %p816_p2, %p815_p1 }
  0x1f   : > { %739 = vmatpush3.msra.mxu1 %v436_v10  ;;  %p811_p0 = pneg %p810_p13 }
  0x20   : > { %740 = vmatprep.subr.mxu1 %v886_v1 }
  0x21   : > { %741 = vmatpush3.msra.mxu1 %v435_v11  ;;  %p818_p5 = pnand %p817_p3, %p811_p0 }
  0x22   : > { %742 = vmatprep.subr.mxu1 %v886_v1 }
  0x23   : > { %743 = vmatpush3.msra.mxu1 %v434_v12 }
  0x24   : > { %744 = vmatprep.subr.mxu1 %v886_v1 }
  0x25   : > { %745 = vmatpush3.msra.mxu1 %v433_v13 }
  0xdd   : > { %v427_v15 = vpop.f32.mrf.mxu0 }
  0xde   : > { %v428_v16 = vadd.f32 %v695_v14, %v427_v15 }
  0xdf   : > { %v729_v17 = vpop.f32.mrf.mxu0 }
  0xe0   : > { %v431_v18 = vmax.f32 %v428_v16, 0.0 }
  0xe2   : > { %747 = vmatmul.mubr.msk.f32.vlgmr.msra.gmra.mxu1 %vm441_vm2, %v431_v18 }
 0x1a2   : > { %v511_v20 = vpop.f32.mrf.mxu1 }
 0x1a3   : > { %v515_v21 = vadd.f32 %v511_v20, %v432_v19 }
 0x1a4   : > { %v748_v22 = vpop.f32.mrf.mxu1 }
 0x1a5   : > { %516 = vst.msk [vmem:[#allocation2] sm:$0xff] %vm343_vm1, %v515_v21 }
 0x1ac   : > { %v520_v24 = vld [vmem:[#allocation2] sm:$0xff] }
 0x1ad   : > { %v528_v25 = vadd.f32 %v698_v23, %v520_v24 }
 0x1af   : > { %v530_v26 = vadd.f32 %v528_v25, %v345_v8 }
 0x1b1   : > { %v531_v27 = vsel %vm343_vm1, %v530_v26, 0.0 }
 0x1b2   : > { %532 = vadd.xlane.f32.xlu0 %v531_v27 }
 0x23b   : > { %v533_v28 = vpop.xlane.xlu0 %532 }
 0x23c   : > { %v535_v29 = vmul.f32 0.03125, %v533_v28 }
 0x23e   : > { %v536_v30 = vsub.f32 %v530_v26, %v535_v29 }
 0x240   : > { %v537_v31 = vmul.f32 %v536_v30, %v536_v30 }
 0x242   : > { %v538_v32 = vsel %vm343_vm1, %v537_v31, 0.0 }
 0x243   : > { %539 = vadd.xlane.f32.xlu0 %v538_v32 }
 0x2cc   : > { %v540_v33 = vpop.xlane.xlu0 %539 }
 0x2cd   : > { %v541_v34 = vmul.f32 0.03125, %v540_v33 }
 0x2cf   : > { %v542_v35 = vadd.f32 1e-05, %v541_v34 }
 0x2d1   : > { %806 = vrsqrt.f32 %v542_v35 }
 0x2de   : > { %v807_v36 = vpop.eup %806 }
 0x2df   : > { %v544_v38 = vmul.f32 %v807_v36, %v536_v30 }
 0x2e1   : > { %v552_v40 = vmul.f32 %v699_v37, %v544_v38 }
 0x2e3   : > { %v560_v41 = vadd.f32 %v700_v39, %v552_v40 }
 0x2e5   : > { %561 = vst.msk [vmem:[%s321_s16] sm:$0xff] %vm343_vm1, %v560_v41 }
 0x2e6   : > { %821 = shalt.err (!%p818_p5)
}
 0x2e7   : > { %s822_s23 = scalar_lea.hbm %s574_s20, 128  ;;  %s826_s15 = scalar_lea.hbm %s1091_s7, 256 }
 0x2e8   : > { %p823_p6 = scmp.ne.s32.totalorder %s574_s20, %s822_s23  ;;  %p827_p10 = scmp.lt.s32.totalorder %s574_s20, %s1091_s7 }
 0x2e9   : > { %p828_p11 = scmp.lt.s32.totalorder %s826_s15, %s822_s23 }
 0x2ea   : > { %p824_p7 = pnand %p823_p6, %p969_p4 }
 0x2eb   : > { %p829_p12 = por %p828_p11, %p827_p10 }
 0x2ec   : > { %p825_p9 = pneg %p824_p7 }
 0x2ee   : > { %p830_p13 = pnand %p829_p12, %p825_p9 }
 0x2f0   : > { %833 = shalt.err (!%p830_p13)
}
 0x2f1   : > { %749 = dma.vmem_to_hbm [thread:$0]  (%p969_p4), %s577_s17, 128, %s574_s20, %s563_s22  }
 0x2f2 PF: > { %p755_p0 = scmp.ge.s32.totalorder %s884_s29, 2  ;;  %s588_s19 = sand.u32 1, %s864_s24  }
 0x2f3   : > { %s589_s30 = scalar_lea.sflag [#allocation4], %s588_s19 }
 0x2f4   : > { %p752_p1 = pnand %p755_p0, %p976_p8 }
 0x2f6   : > { %p753_p2 = pneg %p752_p1 }
 0x2f8   : > { %859 = dma.done.wait (%p753_p2), %s589_s30, 128  }
 0x2f9   : > { %861 = vsyncadd (%p753_p2), %s589_s30, 4294967168  ;;  %s20_s29 = sadd.s32 1, %s884_s29   ;;  %s1094_s24 = smov %s868_s25 }
 0x2fa   : > { %p17_p3 = scmp.ge.s32.totalorder %s20_s29, 4   ;;  %s1095_s25 = smov %s872_s26 }
 0x2fb   : > { %s1096_s26 = smov %s982_s14  ;;  %s1097_s27 = smov %s880_s28 }
 0x2fc   : > { %s1098_s28 = smov %s1100_s9  ;;  %19 = sbr.rel (!%p17_p3) target bundleno = 4 (0x4), region = 100 }
 0x301   :  { %594 = vsyncpa [#allocation4], 1 }
 0x302   :  { %596 = vsyncpa [#allocation4 + $0x1], 1 }

// kernel: decoder_layer.10
= control target key start
LH: loop header
LB: loop body
LE: loop exit
PB: predicated region body
PF: predicated region fallthrough
CT: control target
= control target key end

     0   :  { %s2354_s0 = inlined_call_operand.vmem [shape: f32[2,4,8,8], index: 0, kind: input, shape index: {}]   ;;  %s2355_s1 = inlined_call_operand.vmem [shape: f32[2,4,16,8], index: 1, kind: input, shape index: {}]   ;;  %s2356_s2 = inlined_call_operand.vmem [shape: f32[2,4,16,8], index: 2, kind: input, shape index: {}]   ;;  %s2357_s3 = inlined_call_operand.vmem [shape: f32[2,8,16], index: 3, kind: input, shape index: {}]   ;;  %s2358_s4 = inlined_call_operand.vmem [shape: f32[4,8,32], index: 4, kind: input, shape index: {}]   ;;  %s2359_s5 = inlined_call_operand.vmem [shape: f32[1,32], index: 5, kind: input, shape index: {}]   ;;  %s2360_s6 = inlined_call_operand.vmem [shape: f32[2,8,32], index: 6, kind: input, shape index: {}]   ;;  %s2361_s7 = inlined_call_operand.vmem [shape: f32[1,32], index: 7, kind: input, shape index: {}]   ;;  %s2362_s8 = inlined_call_operand.vmem [shape: f32[1,32], index: 8, kind: input, shape index: {}]   ;;  %s2363_s9 = inlined_call_operand.vmem [shape: f32[2,8,32], index: 9, kind: output, shape index: {0}]   ;;  %s2364_s10 = inlined_call_operand.hbm [shape: f32[2,4,8,16], index: 10, kind: output, shape index: {1}]  }
   0x1   :  { %2365 = sst [smem:[#allocation5_spill]] %s2354_s0 }
   0x2   :  { %2366 = sst [smem:[#allocation6_spill]] %s2355_s1 }
   0x3   :  { %16 = vsyncpa [#allocation3], 0 }
   0x4   :  { %18 = vsyncpa [#allocation3 + $0x1], 0  ;;  %s2086_s13 = smov 0   ;;  %s2088_s14 = smov 0  }
   0x5   :  { %s2090_s15 = smov 0   ;;  %s2092_s16 = smov 0  }
   0x6   :  { %s2094_s17 = smov 0   ;;  %s2096_s18 = smov 0  }
   0x7 LB: > { %s1716_s19 = sadd.s32 4294967295, %s2024_s18   ;;  %s1717_s20 = sadd.s32 4294967294, %s2024_s18   ;;  %s2024_s18 = sphi %s2096_s18, %s24_s18   ;;  %s2020_s17 = sphi %s2094_s17, %s2375_s17   ;;  %s2016_s16 = sphi %s2092_s16, %s2374_s16   ;;  %s2012_s15 = sphi %s2090_s15, %s2373_s15   ;;  %s2008_s14 = sphi %s2088_s14, %s2372_s14   ;;  %s2004_s13 = sphi %s2086_s13, %s2371_s13  }
   0x8   : > { %s36_s21 = sadd.s32 1, %s2020_s17  ;;  %s293_s22 = sadd.s32 1, %s2012_s15 }
   0x9   : > { %p38_p0 = scmp.ge.s32.totalorder %s36_s21, 2  ;;  %p303_p1 = scmp.ne.s32.totalorder %s2012_s15, %s2008_s14 }
   0xa   : > { %p304_p2 = scmp.eq.s32.totalorder %s1716_s19, 1  ;;  %p309_p3 = scmp.ne.s32.totalorder %s2008_s14, %s2004_s13 }
   0xb   : > { %s2377_s21 = smov (%p38_p0, %s36_s21), 0  ;;  %p310_p5 = scmp.eq.s32.totalorder %s1717_s20, 1 }
   0xc   : > { %p2126_p4 = por %p304_p2, %p303_p1  ;;  %s288_s24 = ssub.s32 %s2020_s17, %s2377_s21 }
   0xd   : > { %p1720_p6 = scmp.ge.s32.totalorder %s2024_s18, 1  ;;  %p291_p7 = scmp.eq.s32.totalorder %s288_s24, 0 }
   0xe   : > { %p2133_p8 = por %p310_p5, %p309_p3  ;;  %p387_p9 = scmp.lt.s32.totalorder %s2024_s18, 3 }
   0xf   : > { %s2139_s26 = scalar_select %p291_p7, %s2012_s15, %s293_s22  }
  0x10   : > { %p388_p10 = pnand %p1720_p6, %p387_p9 }
  0x11   : > { %p459_p11 = scmp.lt.s32.totalorder (!%p388_p10), %s2016_s16, 1  ;;  %s2369_s1 = sld [smem:[#allocation6_spill]] (!%p388_p10) }
  0x12   : > { %391 = sbr.rel (%p388_p10) target bundleno = 1256 (0x4e8), region = 56  ;;  %s2370_s0 = sld [smem:[#allocation5_spill]] (!%p388_p10) }
  0x17   : > { %v2026_v0 = vmov 0.0   ;;  %s2145_s27 = scalar_select %p459_p11, %s2016_s16, 1  ;;  %vm2027_vm0 = vmmov 0   ;;  %vm518_vm1 = vcmask 64512   ;;  %vm847_vm3 = vcmask 130048  }
  0x18   : > { %1795 = vmatprep.subr.mxu0 %v2026_v0  ;;  %1802 = vmatprep.subr.mxu1 %v2026_v0  ;;  %vm1496_vm4 = vcmask 261120  }
  0x19   : > { %1799 = vmatprep.mubr.msk.f32.mxu0 %vm2027_vm0, %v2026_v0  ;;  %1806 = vmatprep.mubr.msk.f32.mxu1 %vm2027_vm0, %v2026_v0  ;;  %s1760_s28 = sshll.u32 %s2145_s27, 6  ;;  %s1759_s12 = sshll.u32 %s2145_s27, 5 }
  0x1a   : > { %s471_s11 = scalar_lea.vmem %s2369_s1, %s1760_s28  ;;  %s466_s22 = scalar_lea.vmem %s2370_s0, %s1759_s12 }
  0x1b   : > { %v503_v1 = vld [vmem:[%s471_s11 + $0x8] sm:$0xff]  ;;  %v505_v2 = vld [vmem:[%s471_s11 + $0x18] sm:$0xff]  ;;  %v502_v3 = vld [vmem:[%s471_s11] sm:$0xff]  ;;  %s2190_s24 = sshll.u32 %s2145_s27, 3  ;;  %s2213_s20 = scalar_lea.vmem %s2356_s2, %s1760_s28 }
  0x1c   : > { %1796 = vmatpush3.xpose.msk.msra.mxu0 %vm518_vm1, %v503_v1  ;;  %1803 = vmatpush3.xpose.msk.msra.mxu1 %vm518_vm1, %v505_v2  ;;  %v504_v4 = vld [vmem:[%s471_s11 + $0x10] sm:$0xff]  ;;  %v498_v5 = vld [vmem:[%s466_s22] sm:$0xff]  ;;  %v499_v6 = vld [vmem:[%s466_s22 + $0x8] sm:$0xff]  ;;  %s456_s27 = sand.u32 1, %s2008_s14   ;;  %s490_s12 = scalar_lea.vmem %s2360_s6, %s2190_s24 }
  0x1d   : > { %1797 = vmatprep.subr.mxu0 %v2026_v0  ;;  %1804 = vmatprep.subr.mxu1 %v2026_v0  ;;  %v507_v7 = vld [vmem:[%s471_s11 + $0x28] sm:$0xff]  ;;  %v509_v8 = vld [vmem:[%s471_s11 + $0x38] sm:$0xff]  ;;  %v506_v9 = vld [vmem:[%s471_s11 + $0x20] sm:$0xff]  ;;  %s1721_s28 = sshll.u32 %s456_s27, 5  ;;  %s2298_s19 = scalar_lea.sflag [#allocation3], %s456_s27 }
  0x1e   : > { %v508_v10 = vld [vmem:[%s471_s11 + $0x30] sm:$0xff]  ;;  %v501_v12 = vld [vmem:[%s466_s22 + $0x18] sm:$0xff]  ;;  %s483_s11 = scalar_lea.vmem %s2357_s3, %s2190_s24  ;;  %v511_v54 = vld [vmem:[%s2213_s20 + $0x8] sm:$0xff] }
  0x1f   : > { %v500_v11 = vld [vmem:[%s466_s22 + $0x10] sm:$0xff]  ;;  %v839_v13 = vld [vmem:[%s483_s11] sm:$0xff]  ;;  %v513_v56 = vld [vmem:[%s2213_s20 + $0x18] sm:$0xff]  ;;  %s2227_s22 = scalar_lea.vmem [#allocation2], %s1721_s28  ;;  %s1762_s28 = sshll.u32 %s2016_s16, 9 }
  0x20   : > { %1798 = vmatpush3.xpose.msk.msra.mxu0 %vm518_vm1, %v502_v3  ;;  %1805 = vmatpush3.xpose.msk.msra.mxu1 %vm518_vm1, %v504_v4  ;;  %vm840_vm2 = vcmp.ne.f32.partialorder %v839_v13, 0.0  ;;  %v510_v55 = vld [vmem:[%s2213_s20] sm:$0xff]  ;;  %v512_v57 = vld [vmem:[%s2213_s20 + $0x10] sm:$0xff]  ;;  %v515_v1 = vld [vmem:[%s2213_s20 + $0x28] sm:$0xff]  ;;  %s1553_s29 = sshll.u32 %s2227_s22, 4  ;;  %s2028_s16 = smov [#allocation2]   ;;  %s2294_s29 = int_to_ptr.vmem [resolvable:$true] %s1553_s29 }
  0x21   : > { %1809 = vmatprep.subr.mxu0 %v2026_v0  ;;  %1816 = vmatprep.subr.mxu1 %v2026_v0  ;;  %v514_v2 = vld [vmem:[%s2213_s20 + $0x20] sm:$0xff]  ;;  %v1191_v13 = vld [vmem:[%s2358_s4 + $0x18] sm:$0xff] }
  0x23   : > { %1800 = vmatmul.mubr.msk.f32.vlgmr.msra.gmra.mxu0 %vm518_vm1, %v498_v5  ;;  %1807 = vmatmul.mubr.msk.f32.vlgmr.msra.gmra.mxu1 %vm518_vm1, %v499_v6  ;;  %v517_v5 = vld [vmem:[%s2213_s20 + $0x38] sm:$0xff]  ;;  %v516_v6 = vld [vmem:[%s2213_s20 + $0x30] sm:$0xff]  ;;  %s1948_s20 = scalar_lea.vmem %s2294_s29, 512 }
  0x24   : > { %1810 = vmatpush3.xpose.msk.msra.mxu0 %vm518_vm1, %v507_v7  ;;  %1817 = vmatpush3.xpose.msk.msra.mxu1 %vm518_vm1, %v509_v8  ;;  %p1949_p12 = scmp.ne.s32.totalorder %s2294_s29, %s1948_s20 }
  0x25   : > { %1811 = vmatprep.subr.mxu0 %v2026_v0  ;;  %1818 = vmatprep.subr.mxu1 %v2026_v0 }
  0x26   : > { %1813 = vmatprep.mubr.msk.f32.mxu0 %vm2027_vm0, %v2026_v0  ;;  %1820 = vmatprep.mubr.msk.f32.mxu1 %vm2027_vm0, %v2026_v0  ;;  %p1950_p13 = pnand %p1949_p12, %p2126_p4 }
  0x28   : > { %1812 = vmatpush3.xpose.msk.msra.mxu0 %vm518_vm1, %v506_v9  ;;  %1819 = vmatpush3.xpose.msk.msra.mxu1 %vm518_vm1, %v508_v10  ;;  %p1951_p0 = pneg %p1950_p13 }
  0x29   : > { %1823 = vmatprep.subr.mxu0 %v2026_v0  ;;  %1830 = vmatprep.subr.mxu1 %v2026_v0 }
  0x2b   : > { %1814 = vmatmul.mubr.msk.f32.vlgmr.msra.gmra.mxu0 %vm518_vm1, %v500_v11  ;;  %1821 = vmatmul.mubr.msk.f32.vlgmr.msra.gmra.mxu1 %vm518_vm1, %v501_v12  ;;  %v1188_v11 = vld [vmem:[%s2358_s4] sm:$0xff]  ;;  %v1189_v12 = vld [vmem:[%s2358_s4 + $0x8] sm:$0xff] }
  0x2c   : > { %1827 = vmatprep.mubr.msk.f32.mxu0 %vm2027_vm0, %v2026_v0  ;;  %1834 = vmatprep.mubr.msk.f32.mxu1 %vm2027_vm0, %v2026_v0 }
  0x2d   : > { %1824 = vmatpush3.msra.mxu0 %v511_v54  ;;  %1831 = vmatpush3.msra.mxu1 %v513_v56 }
  0x2e   : > { %1825 = vmatprep.subr.mxu0 %v2026_v0  ;;  %1832 = vmatprep.subr.mxu1 %v2026_v0 }
  0x2f   : > { %1826 = vmatpush3.msra.mxu0 %v510_v55  ;;  %1833 = vmatpush3.msra.mxu1 %v512_v57 }
  0x30   : > { %1837 = vmatprep.subr.mxu0 %v2026_v0  ;;  %1844 = vmatprep.subr.mxu1 %v2026_v0 }
  0xe3   : > { %v594_v14 = vpop.f32.mrf.mxu0  ;;  %v673_v15 = vpop.f32.mrf.mxu1 }
  0xe4   : > { %v835_v16 = vmul.f32 0.35355338, %v594_v14  ;;  %v836_v17 = vmul.f32 0.35355338, %v673_v15 }
  0xe5   : > { %v1801_v18 = vpop.f32.mrf.mxu0  ;;  %v1808_v19 = vpop.f32.mrf.mxu1 }
  0xe6   : > { %v843_v20 = vsel %vm840_vm2, %v835_v16, -1e+09  ;;  %v844_v21 = vsel %vm840_vm2, %v836_v17, -1e+09  ;;  %v1190_v16 = vld [vmem:[%s2358_s4 + $0x10] sm:$0xff] }
  0xe7   : > { %v848_v22 = vsel %vm847_vm3, %v843_v20, -inf  ;;  %v851_v23 = vsel %vm847_vm3, %v844_v21, -inf }
  0xe8   : > { %849 = vmax.xlane.f32.xlu0 %v848_v22 }
  0xeb   : > { %v752_v24 = vpop.f32.mrf.mxu0  ;;  %v831_v25 = vpop.f32.mrf.mxu1 }
  0xec   : > { %v837_v26 = vmul.f32 0.35355338, %v752_v24  ;;  %852 = vmax.xlane.f32.xlu0 %v851_v23  ;;  %v838_v27 = vmul.f32 0.35355338, %v831_v25 }
  0xed   : > { %v1815_v28 = vpop.f32.mrf.mxu0  ;;  %v1822_v29 = vpop.f32.mrf.mxu1 }
  0xee   : > { %v845_v30 = vsel %vm840_vm2, %v837_v26, -1e+09  ;;  %v846_v31 = vsel %vm840_vm2, %v838_v27, -1e+09 }
  0xef   : > { %v854_v32 = vsel %vm847_vm3, %v845_v30, -inf  ;;  %v857_v33 = vsel %vm847_vm3, %v846_v31, -inf }
  0xf0   : > { %855 = vmax.xlane.f32.xlu1 %v854_v32 }
  0xf4   : > { %858 = vmax.xlane.f32.xlu1 %v857_v33 }
 0x171   : > { %v850_v34 = vpop.xlane.xlu0 %849 }
 0x172   : > { %v860_v35 = vsub.f32 %v843_v20, %v850_v34  ;;  %v1494_v34 = vld [vmem:[%s490_s12] sm:$0xff]  ;;  %s2292_s12 = scalar_lea.hbm %s2364_s10, %s1762_s28 }
 0x174   : > { %v864_v36 = vmul.f32 1.442695, %v860_v35 }
 0x175   : > { %v853_v37 = vpop.xlane.xlu0 %852 }
 0x176   : > { %1930 = vpow2.f32 %v864_v36  ;;  %v861_v38 = vsub.f32 %v844_v21, %v853_v37 }
 0x178   : > { %v866_v39 = vmul.f32 1.442695, %v861_v38 }
 0x179   : > { %v856_v40 = vpop.xlane.xlu1 %855 }
 0x17a   : > { %1932 = vpow2.f32 %v866_v39  ;;  %v862_v41 = vsub.f32 %v845_v30, %v856_v40 }
 0x17c   : > { %v868_v42 = vmul.f32 1.442695, %v862_v41 }
 0x17d   : > { %v859_v43 = vpop.xlane.xlu1 %858 }
 0x17e   : > { %1934 = vpow2.f32 %v868_v42  ;;  %v863_v44 = vsub.f32 %v846_v31, %v859_v43  ;;  %v1751_v31 = vld [vmem:[%s2359_s5] ss:$0 sm:$0xff] }
 0x180   : > { %v870_v45 = vmul.f32 1.442695, %v863_v44 }
 0x182   : > { %1936 = vpow2.f32 %v870_v45 }
 0x183   : > { %v1931_v46 = vpop.eup %1930 }
 0x184   : > { %v872_v47 = vsel %vm847_vm3, %v1931_v46, 0.0 }
 0x185   : > { %873 = vadd.xlane.f32.xlu0 %v872_v47 }
 0x187   : > { %v1933_v48 = vpop.eup %1932 }
 0x188   : > { %v875_v49 = vsel %vm847_vm3, %v1933_v48, 0.0 }
 0x189   : > { %876 = vadd.xlane.f32.xlu1 %v875_v49 }
 0x18b   : > { %v1935_v50 = vpop.eup %1934 }
 0x18c   : > { %v878_v51 = vsel %vm847_vm3, %v1935_v50, 0.0 }
 0x18d   : > { %879 = vadd.xlane.f32.xlu0 %v878_v51 }
 0x18f   : > { %v1937_v52 = vpop.eup %1936 }
 0x190   : > { %v881_v53 = vsel %vm847_vm3, %v1937_v52, 0.0 }
 0x191   : > { %882 = vadd.xlane.f32.xlu1 %v881_v53 }
 0x20e   : > { %v874_v58 = vpop.xlane.xlu0 %873 }
 0x20f   : > { %1938 = vrcp.f32 %v874_v58 }
 0x212   : > { %v877_v59 = vpop.xlane.xlu1 %876 }
 0x213   : > { %1940 = vrcp.f32 %v877_v59 }
 0x216   : > { %v880_v60 = vpop.xlane.xlu0 %879 }
 0x217   : > { %1942 = vrcp.f32 %v880_v60 }
 0x21a   : > { %v883_v61 = vpop.xlane.xlu1 %882 }
 0x21b   : > { %1944 = vrcp.f32 %v883_v61 }
 0x21c   : > { %v1939_v62 = vpop.eup %1938 }
 0x21d   : > { %v888_v63 = vmul.f32 %v1939_v62, %v1931_v46 }
 0x21f   : > { %892 = vst.msk [vmem:[%s2227_s22] sm:$0xff] %vm847_vm3, %v888_v63  ;;  %1828 = vmatmul.mubr.msk.f32.vlgmr.msra.gmra.mxu0 %vm847_vm3, %v888_v63 }
 0x220   : > { %v1941_v3 = vpop.eup %1940  ;;  %1838 = vmatpush3.msra.mxu0 %v515_v1  ;;  %1841 = vmatprep.mubr.msk.f32.mxu0 %vm2027_vm0, %v2026_v0 }
 0x221   : > { %v889_v4 = vmul.f32 %v1941_v3, %v1933_v48  ;;  %1839 = vmatprep.subr.mxu0 %v2026_v0 }
 0x222   : > { %1840 = vmatpush3.msra.mxu0 %v514_v2 }
 0x223   : > { %893 = vst.msk [vmem:[%s2227_s22 + $0x8] sm:$0xff] %vm847_vm3, %v889_v4  ;;  %1835 = vmatmul.mubr.msk.f32.vlgmr.msra.gmra.mxu1 %vm847_vm3, %v889_v4  ;;  %1851 = vmatprep.subr.mxu0 %v2026_v0 }
 0x224   : > { %v1943_v7 = vpop.eup %1942  ;;  %1845 = vmatpush3.msra.mxu1 %v517_v5  ;;  %1848 = vmatprep.mubr.msk.f32.mxu1 %vm2027_vm0, %v2026_v0 }
 0x225   : > { %v890_v8 = vmul.f32 %v1943_v7, %v1935_v50  ;;  %1846 = vmatprep.subr.mxu1 %v2026_v0 }
 0x226   : > { %1847 = vmatpush3.msra.mxu1 %v516_v6 }
 0x227   : > { %894 = vst.msk [vmem:[%s2227_s22 + $0x10] sm:$0xff] %vm847_vm3, %v890_v8  ;;  %1842 = vmatmul.mubr.msk.f32.vlgmr.msra.gmra.mxu0 %vm847_vm3, %v890_v8  ;;  %1856 = vmatprep.subr.mxu1 %v2026_v0 }
 0x228   : > { %v1945_v9 = vpop.eup %1944  ;;  %1853 = vmatprep.mubr.msk.f32.mxu0 %vm2027_vm0, %v2026_v0  ;;  %1852 = vmatpush3.msra.mxu0 %v1189_v12 }
 0x229   : > { %v891_v10 = vmul.f32 %v1945_v9, %v1937_v52  ;;  %1861 = vmatprep.subr.mxu0 %v2026_v0 }
 0x22b   : > { %895 = vst.msk [vmem:[%s2227_s22 + $0x18] sm:$0xff] %vm847_vm3, %v891_v10  ;;  %1849 = vmatmul.mubr.msk.f32.vlgmr.msra.gmra.mxu1 %vm847_vm3, %v891_v10  ;;  %s1952_s22 = sshll.u32 %s2028_s16, 4  ;;  %s1953_s22 = int_to_ptr.vmem [resolvable:$false] %s1952_s22 }
 0x22c   : > { %1858 = vmatprep.mubr.msk.f32.mxu1 %vm2027_vm0, %v2026_v0  ;;  %1857 = vmatpush3.msra.mxu1 %v1188_v11  ;;  %s1954_s0 = scalar_lea.vmem %s1953_s22, 1024  ;;  %p1955_p1 = scmp.lt.s32.totalorder %s2294_s29, %s1953_s22 }
 0x22d   : > { %1866 = vmatprep.subr.mxu1 %v2026_v0  ;;  %p1956_p2 = scmp.lt.s32.totalorder %s1954_s0, %s1948_s20 }
 0x22f   : > { %p1957_p3 = por %p1956_p2, %p1955_p1 }
 0x231   : > { %p1958_p5 = pnand %p1957_p3, %p1951_p0 }
 0x2df   : > { %v965_v14 = vpop.f32.mrf.mxu0 }
 0x2e0   : > { %1859 = vmatmul.mubr.msk.f32.vlgmr.msra.gmra.mxu1 %vm518_vm1, %v965_v14 }
 0x2e1   : > { %v1829_v15 = vpop.f32.mrf.mxu0  ;;  %1867 = vmatpush3.msra.mxu1 %v1191_v13  ;;  %1868 = vmatprep.mubr.msk.f32.mxu1 %vm2027_vm0, %v2026_v0 }
 0x2e3   : > { %v1038_v17 = vpop.f32.mrf.mxu1 }
 0x2e4   : > { %1854 = vmatmul.mubr.msk.f32.vlgmr.msra.gmra.mxu0 %vm518_vm1, %v1038_v17 }
 0x2e5   : > { %v1836_v18 = vpop.f32.mrf.mxu1  ;;  %1862 = vmatpush3.msra.mxu0 %v1190_v16  ;;  %1863 = vmatprep.mubr.msk.f32.mxu0 %vm2027_vm0, %v2026_v0 }
 0x2e7   : > { %v1111_v19 = vpop.f32.mrf.mxu0 }
 0x2e8   : > { %1864 = vmatmul.mubr.msk.f32.vlgmr.msra.gmra.mxu0 %vm518_vm1, %v1111_v19 }
 0x2e9   : > { %v1843_v20 = vpop.f32.mrf.mxu0 }
 0x2eb   : > { %v1184_v21 = vpop.f32.mrf.mxu1 }
 0x2ec   : > { %1869 = vmatmul.mubr.msk.f32.vlgmr.msra.gmra.mxu1 %vm518_vm1, %v1184_v21 }
 0x2ed   : > { %v1850_v22 = vpop.f32.mrf.mxu1 }
 0x3a0   : > { %v1334_v23 = vpop.f32.mrf.mxu1 }
 0x3a2   : > { %v1860_v24 = vpop.f32.mrf.mxu1 }
 0x3a4   : > { %v1261_v25 = vpop.f32.mrf.mxu0 }
 0x3a5   : > { %v1335_v28 = vadd.f32 %v1334_v23, %v1261_v25 }
 0x3a6   : > { %v1855_v26 = vpop.f32.mrf.mxu0 }
 0x3a8   : > { %v1407_v27 = vpop.f32.mrf.mxu0 }
 0x3a9   : > { %v1411_v30 = vadd.f32 %v1407_v27, %v1335_v28 }
 0x3aa   : > { %v1865_v29 = vpop.f32.mrf.mxu0 }
 0x3ac   : > { %v1481_v0 = vpop.f32.mrf.mxu1 }
 0x3ad   : > { %v1485_v32 = vadd.f32 %v1481_v0, %v1411_v30 }
 0x3ae   : > { %v1870_v33 = vpop.f32.mrf.mxu1 }
 0x3af   : > { %v1493_v35 = vadd.f32 %v1751_v31, %v1485_v32 }
 0x3b1   : > { %v1495_v36 = vadd.f32 %v1494_v34, %v1493_v35 }
 0x3b3   : > { %v1497_v37 = vsel %vm1496_vm4, %v1495_v36, 0.0 }
 0x3b4   : > { %1498 = vadd.xlane.f32.xlu0 %v1497_v37 }
 0x43d   : > { %v1499_v38 = vpop.xlane.xlu0 %1498 }
 0x43e   : > { %v1501_v39 = vmul.f32 0.03125, %v1499_v38 }
 0x440   : > { %v1502_v40 = vsub.f32 %v1495_v36, %v1501_v39 }
 0x442   : > { %v1503_v41 = vmul.f32 %v1502_v40, %v1502_v40 }
 0x444   : > { %v1504_v42 = vsel %vm1496_vm4, %v1503_v41, 0.0 }
 0x445   : > { %1505 = vadd.xlane.f32.xlu1 %v1504_v42 }
 0x446   : > { %1961 = shalt.err (!%p1958_p5)
}
 0x447   : > { %s1962_s27 = scalar_lea.hbm %s2292_s12, 512  ;;  %s1966_s11 = scalar_lea.hbm %s2364_s10, 1024 }
 0x448   : > { %p1963_p6 = scmp.ne.s32.totalorder %s2292_s12, %s1962_s27  ;;  %p1967_p10 = scmp.lt.s32.totalorder %s2292_s12, %s2364_s10 }
 0x449   : > { %p1968_p11 = scmp.lt.s32.totalorder %s1966_s11, %s1962_s27 }
 0x44a   : > { %p1964_p7 = pnand %p1963_p6, %p2126_p4 }
 0x44b   : > { %p1969_p12 = por %p1968_p11, %p1967_p10 }
 0x44c   : > { %p1965_p9 = pneg %p1964_p7 }
 0x44e   : > { %p1970_p13 = pnand %p1969_p12, %p1965_p9 }
 0x450   : > { %1973 = shalt.err (!%p1970_p13)
}
 0x451   : > { %s2029_s0 = smov 128   ;;  %s2030_s20 = smov 8   ;;  %v1752_v47 = vld [vmem:[%s2361_s7] ss:$0 sm:$0xff] }
 0x452   : > { %1871 = dma.vmem_to_hbm [thread:$0]  (%p2126_p4), %s2294_s29, 512, %s2292_s12, %s2298_s19, %s2029_s0, %s2029_s0, %s2030_s20  }
 0x453   : > { %v1753_v49 = vld [vmem:[%s2362_s8] ss:$0 sm:$0xff]  ;;  %s497_s23 = scalar_lea.vmem %s2363_s9, %s2190_s24 }
 0x4ce   : > { %v1506_v43 = vpop.xlane.xlu1 %1505 }
 0x4cf   : > { %v1507_v44 = vmul.f32 0.03125, %v1506_v43 }
 0x4d1   : > { %v1508_v45 = vadd.f32 1e-05, %v1507_v44 }
 0x4d3   : > { %1946 = vrsqrt.f32 %v1508_v45 }
 0x4e0   : > { %v1947_v46 = vpop.eup %1946 }
 0x4e1   : > { %v1510_v48 = vmul.f32 %v1947_v46, %v1502_v40 }
 0x4e3   : > { %v1518_v50 = vmul.f32 %v1752_v47, %v1510_v48 }
 0x4e5   : > { %v1526_v51 = vadd.f32 %v1753_v49, %v1518_v50 }
 0x4e7   : > { %1527 = vst.msk [vmem:[%s497_s23] sm:$0xff] %vm1496_vm4, %v1526_v51 }
 0x4e8 PF: > { %p1877_p4 = scmp.ge.s32.totalorder %s2024_s18, 2  ;;  %s1578_s29 = sand.u32 1, %s2004_s13  }
 0x4e9   : > { %s1579_s12 = scalar_lea.sflag [#allocation3], %s1578_s29 }
 0x4ea   : > { %p1874_p0 = pnand %p1877_p4, %p2133_p8 }
 0x4ec   : > { %p1875_p1 = pneg %p1874_p0 }
 0x4ee   : > { %1999 = dma.done.wait (%p1875_p1), %s1579_s12, 512  }
 0x4ef   : > { %2001 = vsyncadd (%p1875_p1), %s1579_s12, 4294966784  ;;  %s24_s18 = sadd.s32 1, %s2024_s18   ;;  %s2371_s13 = smov %s2008_s14 }
 0x4f0   : > { %p21_p2 = scmp.ge.s32.totalorder %s24_s18, 4   ;;  %s2372_s14 = smov %s2012_s15 }
 0x4f1   : > { %s2373_s15 = smov %s2139_s26  ;;  %s2374_s16 = smov %s2020_s17 }
 0x4f2   : > { %s2375_s17 = smov %s2377_s21  ;;  %23 = sbr.rel (!%p21_p2) target bundleno = 7 (0x7), region = 115 }
 0x4f7   :  { %1584 = vsyncpa [#allocation3], 1 }
 0x4f8   :  { %1586 = vsyncpa [#allocation3 + $0x1], 1 }

</bundles_post_ra>
